<compile_context>
chip_gen: v7x
topology: tpu7x:2x2x1
jax: 0.10.0
libtpu: 0.0.40
codegen_flags: <defaults>
</compile_context>

<pallas_src>
import functools

import jax
import jax.numpy as jnp
from jax.experimental import pallas as pl
from jax.experimental.pallas import tpu as pltpu

NEG_INF = -1e30


def _round_up(x, m):
    return ((x + m - 1) // m) * m


def knn_prob_kernel(q_ref, tf_ref, oh_ref, out_ref, *, k, inv_temp, n_valid):
    """Per query tile:
       normalize -> bf16 cosine-sim matmul -> k fused max-select iterations that
       build a weighted selection mask -> single gather matmul with the one-hot."""
    q = q_ref[...].astype(jnp.float32)                               # (TQ, D)
    # L2-normalize queries (== F.normalize(p=2, dim=1)); rsqrt keeps it on the EUP.
    qn = q * jax.lax.rsqrt(
        jnp.maximum(jnp.sum(q * q, axis=-1, keepdims=True), 1e-24))
    qn = qn.astype(tf_ref.dtype)                                     # bf16 for the MXU

    # Cosine similarity vs. every datastore entry.  tf_ref is already (D, N_pad),
    # so the MXU gets its RHS directly (no in-kernel transpose).
    sims = jnp.dot(qn, tf_ref[...], preferred_element_type=jnp.float32)  # (TQ, N_pad)

    tq, n_pad = sims.shape
    if n_valid < n_pad:  # static: mask the padded (fake) datastore rows
        lane = jax.lax.broadcasted_iota(jnp.int32, (tq, n_pad), 1)
        sims = jnp.where(lane < n_valid, sims, NEG_INF)

    # Iterative top-k with a single cross-lane max per iteration.
    # The argmax one-hot is recovered by equality against the max; weight is
    # accumulated into wmask and the winner is masked out for the next round.
    # NOTE: exact f32 ties would be selected (and weighted) together in one
    # iteration — an edge case that torch.topk resolves by picking one of them.
    wmask = jnp.zeros_like(sims)                                     # (TQ, N_pad) f32
    for _ in range(k):
        m = jnp.max(sims, axis=-1, keepdims=True)                    # (TQ, 1) XLU reduce
        sel = sims == m                                              # one-hot (per row)
        w = jnp.exp(m * inv_temp)                                    # (TQ, 1) EUP
        wmask = wmask + jnp.where(sel, w, 0.0)                       # VPU FMA
        sims = jnp.where(sel, NEG_INF, sims)

    # Single gather/aggregation matmul: (TQ, N_pad) x (N_pad, C_pad) on the MXU.
    out_ref[...] = jnp.dot(wmask.astype(oh_ref.dtype), oh_ref[...],
                           preferred_element_type=jnp.float32)


def knn_torch_forward(queries, train_features, train_labels, *, k, temp,
                      num_classes, tile_q=128, compute_dtype=jnp.bfloat16):
    """JAX wrapper mirroring KNNtorch._prepare_features + get_knn_prob."""
    Q, D = queries.shape
    N, D2 = train_features.shape
    assert D == D2
    assert k <= N, "k must not exceed the datastore size"

    # --- datastore prep (== _prepare_features with norm_type='L2', + one_hot) ---
    tfn = train_features / jnp.maximum(
        jnp.linalg.norm(train_features, axis=1, keepdims=True), 1e-12)

    n_pad = _round_up(N, 128)                       # lane-dense sims; pad rows masked in-kernel
    c_pad = _round_up(max(num_classes, 128), 128)   # lane-dense output stores (no vst.msk)
    q_pad = _round_up(Q, tile_q)                    # allow any Q (padded rows sliced off)

    # Pre-transposed (D, N_pad) bf16 datastore: MXU RHS layout, no in-kernel .T.
    tf_dn = jnp.zeros((D, n_pad), compute_dtype).at[:, :N].set(
        tfn.T.astype(compute_dtype))
    # bf16 one-hot labels, padded rows are all-zero (contribute nothing).
    onehot = jnp.zeros((n_pad, c_pad), compute_dtype).at[:N].set(
        jax.nn.one_hot(train_labels, c_pad, dtype=compute_dtype))
    q_in = jnp.zeros((q_pad, D), queries.dtype).at[:Q].set(queries)

    kern = functools.partial(knn_prob_kernel, k=k,
                             inv_temp=1.0 / float(temp), n_valid=N)
    out = pl.pallas_call(
        kern,
        out_shape=jax.ShapeDtypeStruct((q_pad, c_pad), jnp.float32),
        grid_spec=pltpu.PrefetchScalarGridSpec(
            num_scalar_prefetch=0,
            grid=(q_pad // tile_q,),
            in_specs=[
                # queries: pipelined per query tile
                pl.BlockSpec((tile_q, D), lambda i: (i, 0)),
                # datastore + one-hot: whole-array VMEM residents (single copy,
                # loaded once — not re-DMA'd / double-buffered per grid step)
                pl.BlockSpec(memory_space=pltpu.MemorySpace.VMEM),
                pl.BlockSpec(memory_space=pltpu.MemorySpace.VMEM),
            ],
            out_specs=pl.BlockSpec((tile_q, c_pad), lambda i: (i, 0)),
        ),
        compiler_params=pltpu.CompilerParams(
            dimension_semantics=("parallel",)),
    )(q_in, tf_dn, onehot)
    return out[:Q, :num_classes]


def knn_reference(queries, train_features, train_labels, *, k, temp, num_classes,
                  compute_dtype=jnp.bfloat16):
    """Plain-JAX reference mirroring KNNtorch.get_knn_prob (same bf16 sims path)."""
    qn = queries / jnp.maximum(
        jnp.linalg.norm(queries, axis=1, keepdims=True), 1e-12)
    tfn = train_features / jnp.maximum(
        jnp.linalg.norm(train_features, axis=1, keepdims=True), 1e-12)
    sims = jnp.dot(qn.astype(compute_dtype), tfn.astype(compute_dtype).T,
                   preferred_element_type=jnp.float32)
    top_sims, top_idx = jax.lax.top_k(sims, k)
    W = jnp.exp(top_sims / temp)
    oh = jax.nn.one_hot(train_labels, num_classes, dtype=jnp.float32)
    return jnp.einsum('qk,qkc->qc', W, oh[top_idx])


if __name__ == "__main__":
    # Small, deterministic synthetic setup (no checkpoint / faiss index).
    # N=120 deliberately not a multiple of 128 to exercise the padding/mask path.
    Q, D, N, C = 16, 32, 120, 10            # queries, feat dim, datastore size, classes
    K, T = 8, 1.0                            # cfg.DSTORE.TOPK, cfg.DSTORE.TEMP

    key = jax.random.PRNGKey(0)
    kq, kf, kl = jax.random.split(key, 3)
    queries = jax.random.normal(kq, (Q, D), dtype=jnp.float32)
    train_features = jax.random.normal(kf, (N, D), dtype=jnp.float32)
    train_labels = jax.random.randint(kl, (N,), 0, C, dtype=jnp.int32)

    out = knn_torch_forward(queries, train_features, train_labels,
                            k=K, temp=T, num_classes=C, tile_q=128)
    out = jax.block_until_ready(out)

    ref = knn_reference(queries, train_features, train_labels,
                        k=K, temp=T, num_classes=C)
    assert out.shape == (Q, C)
    assert jnp.allclose(out, ref, rtol=2e-2, atol=2e-2), "mismatch vs reference"

    # TODO(synk): use_cache/trainid2cache caching and q_ids self-exclusion masking are
    # host-side bookkeeping with no Pallas equivalent; omitted (q_ids=None path only).
    print("KERNEL_OK")
</pallas_src>

<mosaic_0001>
module attributes {stable_mosaic.version = 11 : i64} {
  func.func @knn_prob_kernel(%arg0: i32, %arg1: memref<128x32xf32, #tpu.memory_space<vmem>>, %arg2: memref<32x128xbf16, #tpu.memory_space<vmem>>, %arg3: memref<128x128xbf16, #tpu.memory_space<vmem>>, %arg4: memref<128x128xf32, #tpu.memory_space<vmem>>) attributes {dimension_semantics = [#tpu.dimension_semantics<parallel>], iteration_bounds = array<i64: 1>, scalar_prefetch = 0 : i64, scratch_operands = 0 : i64, tpu.core_type = #tpu.core_type<tc>, window_params = [{transform_indices = @transform_0, window_bounds = array<i64: 128, 32>}, {pipeline_mode = #tpu.pipeline_mode<synchronous>, transform_indices = @transform_1, window_bounds = array<i64: 32, 128>}, {pipeline_mode = #tpu.pipeline_mode<synchronous>, transform_indices = @transform_2, window_bounds = array<i64: 128, 128>}, {transform_indices = @transform_3, window_bounds = array<i64: 128, 128>}]} {
    %c0 = arith.constant 0 : index
    %c0_0 = arith.constant 0 : index
    %0 = vector.load %arg1[%c0, %c0_0] : memref<128x32xf32, #tpu.memory_space<vmem>>, vector<128x32xf32>
    %1 = arith.mulf %0, %0 : vector<128x32xf32>
    %cst = arith.constant dense<0.000000e+00> : vector<128xf32>
    %2 = vector.multi_reduction <add>, %1, %cst [1] : vector<128x32xf32> to vector<128xf32>
    %3 = vector.shape_cast %2 : vector<128xf32> to vector<128x1xf32>
    %cst_1 = arith.constant 1.000000e-24 : f32
    %4 = vector.broadcast %cst_1 : f32 to vector<128x1xf32>
    %5 = arith.maximumf %3, %4 : vector<128x1xf32>
    %6 = math.rsqrt %5 : vector<128x1xf32>
    %7 = vector.broadcast %6 : vector<128x1xf32> to vector<128x32xf32>
    %8 = arith.mulf %0, %7 : vector<128x32xf32>
    %9 = arith.truncf %8 : vector<128x32xf32> to vector<128x32xbf16>
    %c0_2 = arith.constant 0 : index
    %c0_3 = arith.constant 0 : index
    %10 = vector.load %arg2[%c0_2, %c0_3] : memref<32x128xbf16, #tpu.memory_space<vmem>>, vector<32x128xbf16>
    %cst_4 = arith.constant dense<0.000000e+00> : vector<128x128xf32>
    %11 = tpu.matmul %9, %10, %cst_4 {dimension_numbers = #tpu.dot_dimension_numbers<[1], [0], [0], [1], [0, 0, 1, 1], [], []>} : vector<128x32xbf16>, vector<32x128xbf16>, vector<128x128xf32> -> vector<128x128xf32>
    %12 = tpu.iota {dimensions = array<i32: 1>} : vector<128x128xi32>
    %c120_i32 = arith.constant 120 : i32
    %13 = vector.broadcast %c120_i32 : i32 to vector<128x128xi32>
    %14 = arith.cmpi slt, %12, %13 : vector<128x128xi32>
    %cst_5 = arith.constant -1.000000e+30 : f32
    %15 = vector.broadcast %cst_5 : f32 to vector<128x128xf32>
    %16 = arith.select %14, %11, %15 : vector<128x128xi1>, vector<128x128xf32>
    %cst_6 = arith.constant 0.000000e+00 : f32
    %17 = vector.broadcast %cst_6 : f32 to vector<128x128xf32>
    %cst_7 = arith.constant dense<0xFF800000> : vector<128xf32>
    %18 = vector.multi_reduction <maximumf>, %16, %cst_7 [1] : vector<128x128xf32> to vector<128xf32>
    %19 = vector.shape_cast %18 : vector<128xf32> to vector<128x1xf32>
    %20 = vector.broadcast %19 : vector<128x1xf32> to vector<128x128xf32>
    %21 = arith.cmpf oeq, %16, %20 : vector<128x128xf32>
    %cst_8 = arith.constant 1.000000e+00 : f32
    %22 = vector.broadcast %cst_8 : f32 to vector<128x1xf32>
    %23 = arith.mulf %19, %22 : vector<128x1xf32>
    %24 = math.exp %23 : vector<128x1xf32>
    %cst_9 = arith.constant 0.000000e+00 : f32
    %25 = vector.shape_cast %24 : vector<128x1xf32> to vector<128x1xf32>
    %26 = vector.broadcast %25 : vector<128x1xf32> to vector<128x128xf32>
    %27 = vector.broadcast %cst_9 : f32 to vector<128x128xf32>
    %28 = arith.select %21, %26, %27 : vector<128x128xi1>, vector<128x128xf32>
    %29 = arith.addf %17, %28 : vector<128x128xf32>
    %cst_10 = arith.constant -1.000000e+30 : f32
    %30 = vector.broadcast %cst_10 : f32 to vector<128x128xf32>
    %31 = arith.select %21, %30, %16 : vector<128x128xi1>, vector<128x128xf32>
    %cst_11 = arith.constant dense<0xFF800000> : vector<128xf32>
    %32 = vector.multi_reduction <maximumf>, %31, %cst_11 [1] : vector<128x128xf32> to vector<128xf32>
    %33 = vector.shape_cast %32 : vector<128xf32> to vector<128x1xf32>
    %34 = vector.broadcast %33 : vector<128x1xf32> to vector<128x128xf32>
    %35 = arith.cmpf oeq, %31, %34 : vector<128x128xf32>
    %cst_12 = arith.constant 1.000000e+00 : f32
    %36 = vector.broadcast %cst_12 : f32 to vector<128x1xf32>
    %37 = arith.mulf %33, %36 : vector<128x1xf32>
    %38 = math.exp %37 : vector<128x1xf32>
    %cst_13 = arith.constant 0.000000e+00 : f32
    %39 = vector.shape_cast %38 : vector<128x1xf32> to vector<128x1xf32>
    %40 = vector.broadcast %39 : vector<128x1xf32> to vector<128x128xf32>
    %41 = vector.broadcast %cst_13 : f32 to vector<128x128xf32>
    %42 = arith.select %35, %40, %41 : vector<128x128xi1>, vector<128x128xf32>
    %43 = arith.addf %29, %42 : vector<128x128xf32>
    %cst_14 = arith.constant -1.000000e+30 : f32
    %44 = vector.broadcast %cst_14 : f32 to vector<128x128xf32>
    %45 = arith.select %35, %44, %31 : vector<128x128xi1>, vector<128x128xf32>
    %cst_15 = arith.constant dense<0xFF800000> : vector<128xf32>
    %46 = vector.multi_reduction <maximumf>, %45, %cst_15 [1] : vector<128x128xf32> to vector<128xf32>
    %47 = vector.shape_cast %46 : vector<128xf32> to vector<128x1xf32>
    %48 = vector.broadcast %47 : vector<128x1xf32> to vector<128x128xf32>
    %49 = arith.cmpf oeq, %45, %48 : vector<128x128xf32>
    %cst_16 = arith.constant 1.000000e+00 : f32
    %50 = vector.broadcast %cst_16 : f32 to vector<128x1xf32>
    %51 = arith.mulf %47, %50 : vector<128x1xf32>
    %52 = math.exp %51 : vector<128x1xf32>
    %cst_17 = arith.constant 0.000000e+00 : f32
    %53 = vector.shape_cast %52 : vector<128x1xf32> to vector<128x1xf32>
    %54 = vector.broadcast %53 : vector<128x1xf32> to vector<128x128xf32>
    %55 = vector.broadcast %cst_17 : f32 to vector<128x128xf32>
    %56 = arith.select %49, %54, %55 : vector<128x128xi1>, vector<128x128xf32>
    %57 = arith.addf %43, %56 : vector<128x128xf32>
    %cst_18 = arith.constant -1.000000e+30 : f32
    %58 = vector.broadcast %cst_18 : f32 to vector<128x128xf32>
    %59 = arith.select %49, %58, %45 : vector<128x128xi1>, vector<128x128xf32>
    %cst_19 = arith.constant dense<0xFF800000> : vector<128xf32>
    %60 = vector.multi_reduction <maximumf>, %59, %cst_19 [1] : vector<128x128xf32> to vector<128xf32>
    %61 = vector.shape_cast %60 : vector<128xf32> to vector<128x1xf32>
    %62 = vector.broadcast %61 : vector<128x1xf32> to vector<128x128xf32>
    %63 = arith.cmpf oeq, %59, %62 : vector<128x128xf32>
    %cst_20 = arith.constant 1.000000e+00 : f32
    %64 = vector.broadcast %cst_20 : f32 to vector<128x1xf32>
    %65 = arith.mulf %61, %64 : vector<128x1xf32>
    %66 = math.exp %65 : vector<128x1xf32>
    %cst_21 = arith.constant 0.000000e+00 : f32
    %67 = vector.shape_cast %66 : vector<128x1xf32> to vector<128x1xf32>
    %68 = vector.broadcast %67 : vector<128x1xf32> to vector<128x128xf32>
    %69 = vector.broadcast %cst_21 : f32 to vector<128x128xf32>
    %70 = arith.select %63, %68, %69 : vector<128x128xi1>, vector<128x128xf32>
    %71 = arith.addf %57, %70 : vector<128x128xf32>
    %cst_22 = arith.constant -1.000000e+30 : f32
    %72 = vector.broadcast %cst_22 : f32 to vector<128x128xf32>
    %73 = arith.select %63, %72, %59 : vector<128x128xi1>, vector<128x128xf32>
    %cst_23 = arith.constant dense<0xFF800000> : vector<128xf32>
    %74 = vector.multi_reduction <maximumf>, %73, %cst_23 [1] : vector<128x128xf32> to vector<128xf32>
    %75 = vector.shape_cast %74 : vector<128xf32> to vector<128x1xf32>
    %76 = vector.broadcast %75 : vector<128x1xf32> to vector<128x128xf32>
    %77 = arith.cmpf oeq, %73, %76 : vector<128x128xf32>
    %cst_24 = arith.constant 1.000000e+00 : f32
    %78 = vector.broadcast %cst_24 : f32 to vector<128x1xf32>
    %79 = arith.mulf %75, %78 : vector<128x1xf32>
    %80 = math.exp %79 : vector<128x1xf32>
    %cst_25 = arith.constant 0.000000e+00 : f32
    %81 = vector.shape_cast %80 : vector<128x1xf32> to vector<128x1xf32>
    %82 = vector.broadcast %81 : vector<128x1xf32> to vector<128x128xf32>
    %83 = vector.broadcast %cst_25 : f32 to vector<128x128xf32>
    %84 = arith.select %77, %82, %83 : vector<128x128xi1>, vector<128x128xf32>
    %85 = arith.addf %71, %84 : vector<128x128xf32>
    %cst_26 = arith.constant -1.000000e+30 : f32
    %86 = vector.broadcast %cst_26 : f32 to vector<128x128xf32>
    %87 = arith.select %77, %86, %73 : vector<128x128xi1>, vector<128x128xf32>
    %cst_27 = arith.constant dense<0xFF800000> : vector<128xf32>
    %88 = vector.multi_reduction <maximumf>, %87, %cst_27 [1] : vector<128x128xf32> to vector<128xf32>
    %89 = vector.shape_cast %88 : vector<128xf32> to vector<128x1xf32>
    %90 = vector.broadcast %89 : vector<128x1xf32> to vector<128x128xf32>
    %91 = arith.cmpf oeq, %87, %90 : vector<128x128xf32>
    %cst_28 = arith.constant 1.000000e+00 : f32
    %92 = vector.broadcast %cst_28 : f32 to vector<128x1xf32>
    %93 = arith.mulf %89, %92 : vector<128x1xf32>
    %94 = math.exp %93 : vector<128x1xf32>
    %cst_29 = arith.constant 0.000000e+00 : f32
    %95 = vector.shape_cast %94 : vector<128x1xf32> to vector<128x1xf32>
    %96 = vector.broadcast %95 : vector<128x1xf32> to vector<128x128xf32>
    %97 = vector.broadcast %cst_29 : f32 to vector<128x128xf32>
    %98 = arith.select %91, %96, %97 : vector<128x128xi1>, vector<128x128xf32>
    %99 = arith.addf %85, %98 : vector<128x128xf32>
    %cst_30 = arith.constant -1.000000e+30 : f32
    %100 = vector.broadcast %cst_30 : f32 to vector<128x128xf32>
    %101 = arith.select %91, %100, %87 : vector<128x128xi1>, vector<128x128xf32>
    %cst_31 = arith.constant dense<0xFF800000> : vector<128xf32>
    %102 = vector.multi_reduction <maximumf>, %101, %cst_31 [1] : vector<128x128xf32> to vector<128xf32>
    %103 = vector.shape_cast %102 : vector<128xf32> to vector<128x1xf32>
    %104 = vector.broadcast %103 : vector<128x1xf32> to vector<128x128xf32>
    %105 = arith.cmpf oeq, %101, %104 : vector<128x128xf32>
    %cst_32 = arith.constant 1.000000e+00 : f32
    %106 = vector.broadcast %cst_32 : f32 to vector<128x1xf32>
    %107 = arith.mulf %103, %106 : vector<128x1xf32>
    %108 = math.exp %107 : vector<128x1xf32>
    %cst_33 = arith.constant 0.000000e+00 : f32
    %109 = vector.shape_cast %108 : vector<128x1xf32> to vector<128x1xf32>
    %110 = vector.broadcast %109 : vector<128x1xf32> to vector<128x128xf32>
    %111 = vector.broadcast %cst_33 : f32 to vector<128x128xf32>
    %112 = arith.select %105, %110, %111 : vector<128x128xi1>, vector<128x128xf32>
    %113 = arith.addf %99, %112 : vector<128x128xf32>
    %cst_34 = arith.constant -1.000000e+30 : f32
    %114 = vector.broadcast %cst_34 : f32 to vector<128x128xf32>
    %115 = arith.select %105, %114, %101 : vector<128x128xi1>, vector<128x128xf32>
    %cst_35 = arith.constant dense<0xFF800000> : vector<128xf32>
    %116 = vector.multi_reduction <maximumf>, %115, %cst_35 [1] : vector<128x128xf32> to vector<128xf32>
    %117 = vector.shape_cast %116 : vector<128xf32> to vector<128x1xf32>
    %118 = vector.broadcast %117 : vector<128x1xf32> to vector<128x128xf32>
    %119 = arith.cmpf oeq, %115, %118 : vector<128x128xf32>
    %cst_36 = arith.constant 1.000000e+00 : f32
    %120 = vector.broadcast %cst_36 : f32 to vector<128x1xf32>
    %121 = arith.mulf %117, %120 : vector<128x1xf32>
    %122 = math.exp %121 : vector<128x1xf32>
    %cst_37 = arith.constant 0.000000e+00 : f32
    %123 = vector.shape_cast %122 : vector<128x1xf32> to vector<128x1xf32>
    %124 = vector.broadcast %123 : vector<128x1xf32> to vector<128x128xf32>
    %125 = vector.broadcast %cst_37 : f32 to vector<128x128xf32>
    %126 = arith.select %119, %124, %125 : vector<128x128xi1>, vector<128x128xf32>
    %127 = arith.addf %113, %126 : vector<128x128xf32>
    %128 = arith.truncf %127 : vector<128x128xf32> to vector<128x128xbf16>
    %c0_38 = arith.constant 0 : index
    %c0_39 = arith.constant 0 : index
    %129 = vector.load %arg3[%c0_38, %c0_39] : memref<128x128xbf16, #tpu.memory_space<vmem>>, vector<128x128xbf16>
    %cst_40 = arith.constant dense<0.000000e+00> : vector<128x128xf32>
    %130 = tpu.matmul %128, %129, %cst_40 {dimension_numbers = #tpu.dot_dimension_numbers<[1], [0], [0], [1], [0, 0, 1, 1], [], []>} : vector<128x128xbf16>, vector<128x128xbf16>, vector<128x128xf32> -> vector<128x128xf32>
    %c0_41 = arith.constant 0 : index
    %c0_42 = arith.constant 0 : index
    %131 = vector.load %arg4[%c0_41, %c0_42] : memref<128x128xf32, #tpu.memory_space<vmem>>, vector<128x128xf32>
    tpu.vector_store %arg4[%c0_41, %c0_42], %130 {strides = array<i32>} : memref<128x128xf32, #tpu.memory_space<vmem>>, vector<128x128xf32>,
    return
  }
  func.func @transform_0(%arg0: i32) -> (i32, i32) {
    %c0_i32 = arith.constant 0 : i32
    %c0_i32_0 = arith.constant 0 : i32
    return %arg0, %c0_i32 : i32, i32
  }
  func.func @transform_1(%arg0: i32) -> (i32, i32) {
    %c0_i32 = arith.constant 0 : i32
    %c0_i32_0 = arith.constant 0 : i32
    %c0_i32_1 = arith.constant 0 : i32
    return %c0_i32, %c0_i32_0 : i32, i32
  }
  func.func @transform_2(%arg0: i32) -> (i32, i32) {
    %c0_i32 = arith.constant 0 : i32
    %c0_i32_0 = arith.constant 0 : i32
    %c0_i32_1 = arith.constant 0 : i32
    return %c0_i32, %c0_i32_0 : i32, i32
  }
  func.func @transform_3(%arg0: i32) -> (i32, i32) {
    %c0_i32 = arith.constant 0 : i32
    %c0_i32_0 = arith.constant 0 : i32
    return %arg0, %c0_i32 : i32, i32
  }
}

</mosaic_0001>

<bundles_post_ra>
// kernel: tpu_custom_call.1
= control target key start
LH: loop header
LB: loop body
LE: loop exit
PB: predicated region body
PF: predicated region fallthrough
CT: control target
= control target key end

     0   :  { %vm48_vm0 = vcmask 261120   ;;  %s3788_s0 = inlined_call_operand.vmem [shape: f32[128,32], index: 0, kind: input, shape index: {}]   ;;  %s3789_s1 = inlined_call_operand.vmem [shape: bf16[32,128], index: 1, kind: input, shape index: {}]   ;;  %s3790_s2 = inlined_call_operand.vmem [shape: bf16[128,128], index: 2, kind: input, shape index: {}]   ;;  %s3791_s3 = inlined_call_operand.hbm [shape: f32[128,128], index: 3, kind: output, shape index: {}]  }
   0x1   :  { %v1981_v0 = vld [vmem:[%s3788_s0 + $0x10] sm:$0xff]  ;;  %v1986_v1 = vld [vmem:[%s3788_s0] sm:$0xff]  ;;  %v1991_v2 = vld [vmem:[%s3788_s0 + $0x18] sm:$0xff] }
   0x2   :  { %v34_v3 = vmul.f32 %v1981_v0, %v1981_v0  ;;  %v32_v4 = vmul.f32 %v1986_v1, %v1986_v1  ;;  %v35_v5 = vmul.f32 %v1991_v2, %v1991_v2  ;;  %v2002_v6 = vld [vmem:[%s3788_s0 + $0x8] sm:$0xff]  ;;  %v2014_v9 = vld [vmem:[%s3788_s0 + $0x20] sm:$0xff]  ;;  %v2021_v12 = vld [vmem:[%s3788_s0 + $0x38] sm:$0xff] }
   0x3   :  { %v33_v7 = vmul.f32 %v2002_v6, %v2002_v6  ;;  %v2009_v8 = vld [vmem:[%s3788_s0 + $0x28] sm:$0xff]  ;;  %v2026_v13 = vld [vmem:[%s3788_s0 + $0x30] sm:$0xff]  ;;  %v36_v17 = vmul.f32 %v2014_v9, %v2014_v9  ;;  %v39_v18 = vmul.f32 %v2021_v12, %v2021_v12  ;;  %v2046_v21 = vld [vmem:[%s3788_s0 + $0x40] sm:$0xff] }
   0x4   :  { %v55_v10 = vsel %vm48_vm0, %v34_v3, 0.0  ;;  %v49_v11 = vsel %vm48_vm0, %v32_v4, 0.0  ;;  %v58_v14 = vsel %vm48_vm0, %v35_v5, 0.0  ;;  %v37_v16 = vmul.f32 %v2009_v8, %v2009_v8  ;;  %v2041_v20 = vld [vmem:[%s3788_s0 + $0x48] sm:$0xff]  ;;  %v2055_v26 = vld [vmem:[%s3788_s0 + $0x58] sm:$0xff]  ;;  %v2064_v29 = vld [vmem:[%s3788_s0 + $0x50] sm:$0xff] }
   0x5   :  { %56 = vadd.xlane.f32.xlu1 %v55_v10  ;;  %50 = vadd.xlane.f32.xlu0 %v49_v11  ;;  %v52_v15 = vsel %vm48_vm0, %v33_v7, 0.0  ;;  %v38_v19 = vmul.f32 %v2026_v13, %v2026_v13  ;;  %v61_v23 = vsel %vm48_vm0, %v36_v17, 0.0  ;;  %v70_v24 = vsel %vm48_vm0, %v39_v18, 0.0 }
   0x6   :  { %v64_v22 = vsel %vm48_vm0, %v37_v16, 0.0  ;;  %v41_v27 = vmul.f32 %v2041_v20, %v2041_v20  ;;  %v40_v28 = vmul.f32 %v2046_v21, %v2046_v21 }
   0x7   :  { %v67_v25 = vsel %vm48_vm0, %v38_v19, 0.0 }
   0x9   :  { %59 = vadd.xlane.f32.xlu1 %v58_v14  ;;  %53 = vadd.xlane.f32.xlu0 %v52_v15 }
   0xd   :  { %65 = vadd.xlane.f32.xlu1 %v64_v22  ;;  %62 = vadd.xlane.f32.xlu0 %v61_v23 }
   0xe   :  { %8 = vsyncpa [#allocation3], 0  ;;  %v76_v30 = vsel %vm48_vm0, %v41_v27, 0.0  ;;  %v73_v31 = vsel %vm48_vm0, %v40_v28, 0.0  ;;  %v43_v32 = vmul.f32 %v2055_v26, %v2055_v26  ;;  %v42_v33 = vmul.f32 %v2064_v29, %v2064_v29  ;;  %v2075_v34 = vld [vmem:[%s3788_s0 + $0x68] sm:$0xff]  ;;  %v2080_v35 = vld [vmem:[%s3788_s0 + $0x60] sm:$0xff] }
   0xf   :  { %v45_v38 = vmul.f32 %v2075_v34, %v2075_v34  ;;  %v44_v39 = vmul.f32 %v2080_v35, %v2080_v35  ;;  %v2091_v40 = vld [vmem:[%s3788_s0 + $0x78] sm:$0xff]  ;;  %v2096_v41 = vld [vmem:[%s3788_s0 + $0x70] sm:$0xff]  ;;  %v1633_v48 = vld [vmem:[%s3789_s1] sm:$0xff]  }
  0x10   :  { %v82_v36 = vsel %vm48_vm0, %v43_v32, 0.0  ;;  %v79_v37 = vsel %vm48_vm0, %v42_v33, 0.0  ;;  %v47_v44 = vmul.f32 %v2091_v40, %v2091_v40  ;;  %v46_v45 = vmul.f32 %v2096_v41, %v2096_v41  ;;  %1562 = vmatprep.subr.bf16.mxu0 %v1633_v48  ;;  %v1634_v49 = vld [vmem:[%s3789_s1 + $0x8] sm:$0xff]  }
  0x11   :  { %71 = vadd.xlane.f32.xlu1 %v70_v24  ;;  %68 = vadd.xlane.f32.xlu0 %v67_v25  ;;  %v88_v42 = vsel %vm48_vm0, %v45_v38, 0.0  ;;  %v85_v43 = vsel %vm48_vm0, %v44_v39, 0.0 }
  0x12   :  { %v94_v46 = vsel %vm48_vm0, %v47_v44, 0.0  ;;  %v91_v47 = vsel %vm48_vm0, %v46_v45, 0.0  ;;  %1563 = vmatpush3.bf16.msra.mxu0 %v1633_v48 }
  0x13   :  { %1564 = vmatprep.subr.bf16.mxu0 %v1634_v49 }
  0x15   :  { %77 = vadd.xlane.f32.xlu1 %v76_v30  ;;  %74 = vadd.xlane.f32.xlu0 %v73_v31 }
  0x16   :  { %1565 = vmatpush3.bf16.msra.mxu0 %v1634_v49 }
  0x19   :  { %83 = vadd.xlane.f32.xlu1 %v82_v36  ;;  %80 = vadd.xlane.f32.xlu0 %v79_v37 }
  0x1d   :  { %89 = vadd.xlane.f32.xlu1 %v88_v42  ;;  %86 = vadd.xlane.f32.xlu0 %v85_v43 }
  0x21   :  { %95 = vadd.xlane.f32.xlu1 %v94_v46  ;;  %92 = vadd.xlane.f32.xlu0 %v91_v47 }
  0x92   :  { %v57_v50 = vpop.xlane.xlu1 %56  ;;  %v51_v51 = vpop.xlane.xlu0 %50 }
  0x93   :  { %v99_v52 = vmax.f32 %v57_v50, 1e-24  ;;  %v97_v53 = vmax.f32 %v51_v51, 1e-24 }
  0x95   :  { %1643 = vrsqrt.f32 %v99_v52 }
  0x96   :  { %v60_v54 = vpop.xlane.xlu1 %59  ;;  %v54_v55 = vpop.xlane.xlu0 %53  ;;  %1645 = vrsqrt.f32 %v97_v53 }
  0x97   :  { %v100_v56 = vmax.f32 %v60_v54, 1e-24  ;;  %v98_v57 = vmax.f32 %v54_v55, 1e-24 }
  0x99   :  { %1647 = vrsqrt.f32 %v100_v56 }
  0x9a   :  { %1649 = vrsqrt.f32 %v98_v57  ;;  %v66_v58 = vpop.xlane.xlu1 %65  ;;  %v63_v59 = vpop.xlane.xlu0 %62 }
  0x9b   :  { %v102_v60 = vmax.f32 %v66_v58, 1e-24  ;;  %v101_v61 = vmax.f32 %v63_v59, 1e-24 }
  0x9d   :  { %1651 = vrsqrt.f32 %v102_v60 }
  0x9e   :  { %1653 = vrsqrt.f32 %v101_v61  ;;  %v72_v62 = vpop.xlane.xlu1 %71  ;;  %v69_v63 = vpop.xlane.xlu0 %68 }
  0x9f   :  { %v104_v3 = vmax.f32 %v72_v62, 1e-24  ;;  %v103_v4 = vmax.f32 %v69_v63, 1e-24  ;;  %v1644_v5 = vpop.eup %1643 }
  0xa0   :  { %v1646_v7 = vpop.eup %1645  ;;  %v131_v18 = vmul.f32 %v1644_v5, %v1981_v0 }
  0xa1   :  { %1655 = vrsqrt.f32 %v104_v3  ;;  %v129_v22 = vmul.f32 %v1646_v7, %v1986_v1 }
  0xa2   :  { %1657 = vrsqrt.f32 %v103_v4  ;;  %v78_v10 = vpop.xlane.xlu1 %77  ;;  %v75_v11 = vpop.xlane.xlu0 %74 }
  0xa3   :  { %v1648_v14 = vpop.eup %1647  ;;  %v106_v15 = vmax.f32 %v78_v10, 1e-24  ;;  %v105_v16 = vmax.f32 %v75_v11, 1e-24 }
  0xa4   :  { %v1650_v17 = vpop.eup %1649  ;;  %v132_v19 = vmul.f32 %v1648_v14, %v1991_v2 }
  0xa5   :  { %1659 = vrsqrt.f32 %v106_v15  ;;  %v130_v23 = vmul.f32 %v1650_v17, %v2002_v6 }
  0xa6   :  { %1661 = vrsqrt.f32 %v105_v16  ;;  %v84_v24 = vpop.xlane.xlu1 %83  ;;  %v81_v25 = vpop.xlane.xlu0 %80  ;;  %v146_v27 = vpack.c.bf16 %v132_v19, %v131_v18 }
  0xa7   :  { %v1652_v28 = vpop.eup %1651  ;;  %v108_v30 = vmax.f32 %v84_v24, 1e-24  ;;  %v107_v31 = vmax.f32 %v81_v25, 1e-24  ;;  %v145_v32 = vpack.c.bf16 %v130_v23, %v129_v22 }
  0xa8   :  { %v1654_v33 = vpop.eup %1653  ;;  %v134_v36 = vmul.f32 %v1652_v28, %v2009_v8 }
  0xa9   :  { %1663 = vrsqrt.f32 %v108_v30  ;;  %1566 = vmatprep.mubr.msk.bf16.mxu0 %vm48_vm0, %v145_v32  ;;  %v133_v0 = vmul.f32 %v1654_v33, %v2014_v9 }
  0xaa   :  { %1665 = vrsqrt.f32 %v107_v31  ;;  %1567 = vmatmul.mubr.msk.bf16.vlgmr.msra.gmra.mrb[0].mxu0 %vm48_vm0, %v146_v27  ;;  %v90_v1 = vpop.xlane.xlu1 %89  ;;  %v87_v2 = vpop.xlane.xlu0 %86 }
  0xab   :  { %v1656_v6 = vpop.eup %1655  ;;  %v110_v37 = vmax.f32 %v90_v1, 1e-24  ;;  %v109_v38 = vmax.f32 %v87_v2, 1e-24  ;;  %v147_v39 = vpack.c.bf16 %v134_v36, %v133_v0 }
  0xac   :  { %v1658_v42 = vpop.eup %1657  ;;  %v136_v43 = vmul.f32 %v1656_v6, %v2021_v12 }
  0xad   :  { %1667 = vrsqrt.f32 %v110_v37  ;;  %1570 = vmatprep.mubr.msk.bf16.mxu0 %vm48_vm0, %v147_v39  ;;  %v135_v8 = vmul.f32 %v1658_v42, %v2026_v13 }
  0xae   :  { %1669 = vrsqrt.f32 %v109_v38  ;;  %v96_v44 = vpop.xlane.xlu1 %95  ;;  %v93_v9 = vpop.xlane.xlu0 %92 }
  0xaf   :  { %v1660_v45 = vpop.eup %1659  ;;  %v112_v46 = vmax.f32 %v96_v44, 1e-24  ;;  %v111_v47 = vmax.f32 %v93_v9, 1e-24  ;;  %v148_v48 = vpack.c.bf16 %v136_v43, %v135_v8 }
  0xb0   :  { %v1662_v49 = vpop.eup %1661  ;;  %v138_v50 = vmul.f32 %v1660_v45, %v2041_v20 }
  0xb1   :  { %1671 = vrsqrt.f32 %v112_v46  ;;  %v137_v51 = vmul.f32 %v1662_v49, %v2046_v21 }
  0xb2   :  { %1673 = vrsqrt.f32 %v111_v47  ;;  %1571 = vmatmul.mubr.msk.bf16.gmra.mrb[4].mxu0 %vm48_vm0, %v148_v48 }
  0xb3   :  { %v1664_v12 = vpop.eup %1663  ;;  %v149_v52 = vpack.c.bf16 %v138_v50, %v137_v51 }
  0xb4   :  { %v1666_v53 = vpop.eup %1665  ;;  %v140_v13 = vmul.f32 %v1664_v12, %v2055_v26 }
  0xb5   :  { %1574 = vmatprep.mubr.msk.bf16.mxu0 %vm48_vm0, %v149_v52  ;;  %v139_v54 = vmul.f32 %v1666_v53, %v2064_v29  ;;  %v290_v29 = vlaneseq }
  0xb7   :  { %v1668_v55 = vpop.eup %1667  ;;  %v150_v56 = vpack.c.bf16 %v140_v13, %v139_v54  ;;  %v291_v63 = vand.u32 127, %v290_v29 }
  0xb8   :  { %v1670_v57 = vpop.eup %1669  ;;  %v142_v20 = vmul.f32 %v1668_v55, %v2075_v34 }
  0xb9   :  { %v141_v58 = vmul.f32 %v1670_v57, %v2080_v35  ;;  %vm292_vm1 = vcmp.lt.s32.totalorder %v291_v63, 120 }
  0xba   :  { %1575 = vmatmul.mubr.msk.bf16.gmra.mrb[8].mxu0 %vm48_vm0, %v150_v56 }
  0xbb   :  { %v1672_v21 = vpop.eup %1671  ;;  %v151_v59 = vpack.c.bf16 %v142_v20, %v141_v58 }
  0xbc   :  { %v1674_v60 = vpop.eup %1673  ;;  %v144_v61 = vmul.f32 %v1672_v21, %v2091_v40 }
  0xbd   :  { %1578 = vmatprep.mubr.msk.bf16.mxu0 %vm48_vm0, %v151_v59  ;;  %v143_v26 = vmul.f32 %v1674_v60, %v2096_v41 }
  0xbf   :  { %v152_v62 = vpack.c.bf16 %v144_v61, %v143_v26 }
  0xc2   :  { %1579 = vmatmul.mubr.msk.bf16.gmra.mrb[12].mxu0 %vm48_vm0, %v152_v62 }
 0x17d   :  { %v1568_v34 = vpop.f32.mrb[0].mxu0 }
 0x17e   :  { %v227_v3 = vpop.f32.mrb[1].mxu0  ;;  %v2177_v31 = vsel %vm292_vm1, %v1568_v34, -1e+30 }
 0x17f   :  { %v2137_v35 = vsel %vm292_vm1, %v227_v3, -1e+30  ;;  %v1569_v4 = vpop.f32.mrb[2].mxu0 }
 0x180   :  { %309 = vmax.xlane.f32.xlu0 %v2137_v35  ;;  %v230_v5 = vpop.f32.mrb[3].mxu0  ;;  %v2181_v36 = vsel %vm292_vm1, %v1569_v4, -1e+30 }
 0x181   :  { %v2141_v40 = vsel %vm292_vm1, %v230_v5, -1e+30 }
 0x182   :  { %311 = vmax.xlane.f32.xlu1 %v2141_v40 }
 0x185   :  { %v1572_v41 = vpop.f32.mrb[4].mxu0 }
 0x186   :  { %v2145_v7 = vsel %vm292_vm1, %v1572_v41, -1e+30  ;;  %v243_v10 = vpop.f32.mrb[5].mxu0 }
 0x187   :  { %321 = vmax.xlane.f32.xlu0 %v2145_v7  ;;  %v1573_v11 = vpop.f32.mrb[6].mxu0  ;;  %v2153_v16 = vsel %vm292_vm1, %v243_v10, -1e+30 }
 0x188   :  { %v2149_v14 = vsel %vm292_vm1, %v1573_v11, -1e+30  ;;  %v246_v15 = vpop.f32.mrb[7].mxu0 }
 0x189   :  { %323 = vmax.xlane.f32.xlu1 %v2149_v14  ;;  %v2157_v17 = vsel %vm292_vm1, %v246_v15, -1e+30 }
 0x18b   :  { %317 = vmax.xlane.f32.xlu0 %v2153_v16 }
 0x18d   :  { %319 = vmax.xlane.f32.xlu1 %v2157_v17  ;;  %v1576_v18 = vpop.f32.mrb[8].mxu0 }
 0x18e   :  { %v2161_v19 = vsel %vm292_vm1, %v1576_v18, -1e+30  ;;  %v259_v22 = vpop.f32.mrb[9].mxu0 }
 0x18f   :  { %329 = vmax.xlane.f32.xlu0 %v2161_v19  ;;  %v1577_v23 = vpop.f32.mrb[10].mxu0  ;;  %v2169_v27 = vsel %vm292_vm1, %v259_v22, -1e+30 }
 0x190   :  { %v2165_v24 = vsel %vm292_vm1, %v1577_v23, -1e+30  ;;  %v262_v25 = vpop.f32.mrb[11].mxu0 }
 0x191   :  { %331 = vmax.xlane.f32.xlu1 %v2165_v24  ;;  %v2173_v28 = vsel %vm292_vm1, %v262_v25, -1e+30 }
 0x193   :  { %325 = vmax.xlane.f32.xlu0 %v2169_v27 }
 0x195   :  { %327 = vmax.xlane.f32.xlu1 %v2173_v28  ;;  %v1580_v30 = vpop.f32.mrb[12].mxu0 }
 0x196   :  { %v275_v32 = vpop.f32.mrb[13].mxu0  ;;  %v2193_v6 = vsel %vm292_vm1, %v1580_v30, -1e+30 }
 0x197   :  { %313 = vmax.xlane.f32.xlu0 %v2177_v31  ;;  %v1581_v33 = vpop.f32.mrb[14].mxu0  ;;  %v2184_v0 = vsel %vm292_vm1, %v275_v32, -1e+30 }
 0x198   :  { %v278_v1 = vpop.f32.mrb[15].mxu0  ;;  %v2197_v37 = vsel %vm292_vm1, %v1581_v33, -1e+30 }
 0x199   :  { %315 = vmax.xlane.f32.xlu1 %v2181_v36  ;;  %v2189_v2 = vsel %vm292_vm1, %v278_v1, -1e+30  ;;  %3806 = vst [vmem:[#allocation5_spill] sm:$0xff] %v2197_v37 }
 0x19b   :  { %333 = vmax.xlane.f32.xlu0 %v2184_v0 }
 0x19d   :  { %335 = vmax.xlane.f32.xlu1 %v2189_v2 }
 0x19f   :  { %337 = vmax.xlane.f32.xlu0 %v2193_v6 }
 0x1a1   :  { %339 = vmax.xlane.f32.xlu1 %v2197_v37 }
 0x20d   :  { %v2200_v38 = vpop.xlane.xlu0 %309 }
 0x20e   :  { %vm341_vm2 = vcmp.eq.f32.partialorder %v2137_v35, %v2200_v38  ;;  %v357_v34 = vmul.f32 1.442695, %v2200_v38 }
 0x20f   :  { %v2204_v39 = vpop.xlane.xlu1 %311  ;;  %v2210_v42 = vsel %vm341_vm2, -1e+30, %v2137_v35 }
 0x210   :  { %437 = vmax.xlane.f32.xlu0 %v2210_v42  ;;  %vm342_vm3 = vcmp.eq.f32.partialorder %v2141_v40, %v2204_v39  ;;  %v359_v3 = vmul.f32 1.442695, %v2204_v39  ;;  %1675 = vpow2.f32 %v357_v34 }
 0x211   :  { %v2219_v43 = vsel %vm342_vm3, -1e+30, %v2141_v40 }
 0x212   :  { %439 = vmax.xlane.f32.xlu1 %v2219_v43  ;;  %1677 = vpow2.f32 %v359_v3 }
 0x214   :  { %v2222_v8 = vpop.xlane.xlu0 %321 }
 0x215   :  { %vm347_vm4 = vcmp.eq.f32.partialorder %v2145_v7, %v2222_v8  ;;  %v369_v4 = vmul.f32 1.442695, %v2222_v8 }
 0x216   :  { %v2226_v44 = vpop.xlane.xlu1 %323  ;;  %v2232_v9 = vsel %vm347_vm4, -1e+30, %v2145_v7 }
 0x217   :  { %449 = vmax.xlane.f32.xlu0 %v2232_v9  ;;  %vm348_vm5 = vcmp.eq.f32.partialorder %v2149_v14, %v2226_v44  ;;  %v371_v10 = vmul.f32 1.442695, %v2226_v44 }
 0x218   :  { %v2237_v45 = vpop.xlane.xlu0 %317  ;;  %v2243_v46 = vsel %vm348_vm5, -1e+30, %v2149_v14 }
 0x219   :  { %451 = vmax.xlane.f32.xlu1 %v2243_v46  ;;  %vm345_vm6 = vcmp.eq.f32.partialorder %v2153_v16, %v2237_v45  ;;  %v365_v18 = vmul.f32 1.442695, %v2237_v45 }
 0x21a   :  { %v2248_v47 = vpop.xlane.xlu1 %319  ;;  %v2254_v48 = vsel %vm345_vm6, -1e+30, %v2153_v16  ;;  %v1676_v1 = vpop.eup %1675 }
 0x21b   :  { %445 = vmax.xlane.f32.xlu0 %v2254_v48  ;;  %vm346_vm7 = vcmp.eq.f32.partialorder %v2157_v17, %v2248_v47  ;;  %v367_v23 = vmul.f32 1.442695, %v2248_v47 }
 0x21c   :  { %v2259_v49 = vpop.xlane.xlu0 %329  ;;  %v2265_v50 = vsel %vm346_vm7, -1e+30, %v2157_v17 }
 0x21d   :  { %447 = vmax.xlane.f32.xlu1 %v2265_v50  ;;  %vm351_vm8 = vcmp.eq.f32.partialorder %v2161_v19, %v2259_v49  ;;  %v377_v30 = vmul.f32 1.442695, %v2259_v49 }
 0x21e   :  { %v2270_v51 = vpop.xlane.xlu1 %331  ;;  %v2276_v12 = vsel %vm351_vm8, -1e+30, %v2161_v19 }
 0x21f   :  { %457 = vmax.xlane.f32.xlu0 %v2276_v12  ;;  %vm352_vm9 = vcmp.eq.f32.partialorder %v2165_v24, %v2270_v51 }
 0x220   :  { %v2281_v52 = vpop.xlane.xlu0 %325  ;;  %v2287_v53 = vsel %vm352_vm9, -1e+30, %v2165_v24 }
 0x221   :  { %459 = vmax.xlane.f32.xlu1 %v2287_v53  ;;  %vm349_vm10 = vcmp.eq.f32.partialorder %v2169_v27, %v2281_v52 }
 0x222   :  { %v2292_v13 = vpop.xlane.xlu1 %327  ;;  %v2298_v54 = vsel %vm349_vm10, -1e+30, %v2169_v27 }
 0x223   :  { %453 = vmax.xlane.f32.xlu0 %v2298_v54  ;;  %vm350_vm11 = vcmp.eq.f32.partialorder %v2173_v28, %v2292_v13  ;;  %v375_v38 = vmul.f32 1.442695, %v2292_v13 }
 0x224   :  { %v2303_v55 = vpop.xlane.xlu0 %313  ;;  %v2309_v56 = vsel %vm350_vm11, -1e+30, %v2173_v28 }
 0x225   :  { %455 = vmax.xlane.f32.xlu1 %v2309_v56  ;;  %vm343_vm12 = vcmp.eq.f32.partialorder %v2177_v31, %v2303_v55 }
 0x226   :  { %v2314_v57 = vpop.xlane.xlu1 %315  ;;  %v2320_v20 = vsel %vm343_vm12, -1e+30, %v2177_v31 }
 0x227   :  { %441 = vmax.xlane.f32.xlu0 %v2320_v20  ;;  %vm3796_vm13 = vcmp.eq.f32.partialorder %v2181_v36, %v2314_v57 }
 0x228   :  { %v2325_v58 = vpop.xlane.xlu0 %333  ;;  %v2331_v21 = vsel %vm3796_vm13, -1e+30, %v2181_v36 }
 0x229   :  { %443 = vmax.xlane.f32.xlu1 %v2331_v21  ;;  %vm3795_vm14 = vcmp.eq.f32.partialorder %v2184_v0, %v2325_v58 }
 0x22a   :  { %v2336_v59 = vpop.xlane.xlu1 %335  ;;  %v2342_v60 = vsel %vm3795_vm14, -1e+30, %v2184_v0 }
 0x22b   :  { %461 = vmax.xlane.f32.xlu0 %v2342_v60  ;;  %vm3794_vm15 = vcmp.eq.f32.partialorder %v2189_v2, %v2336_v59 }
 0x22c   :  { %v2347_v61 = vpop.xlane.xlu0 %337  ;;  %v2353_v26 = vsel %vm3794_vm15, -1e+30, %v2189_v2 }
 0x22d   :  { %463 = vmax.xlane.f32.xlu1 %v2353_v26  ;;  %vm3792_vm0 = vcmp.eq.f32.partialorder %v2193_v6, %v2347_v61  ;;  %v385_v49 = vmul.f32 1.442695, %v2347_v61 }
 0x22e   :  { %v2358_v62 = vpop.xlane.xlu1 %339  ;;  %v2364_v29 = vsel %vm3792_vm0, -1e+30, %v2193_v6 }
 0x22f   :  { %465 = vmax.xlane.f32.xlu0 %v2364_v29  ;;  %vm3793_vm1 = vcmp.eq.f32.partialorder %v2197_v37, %v2358_v62 }
 0x230   :  { %v2373_v63 = vsel %vm3793_vm1, -1e+30, %v2197_v37 }
 0x231   :  { %467 = vmax.xlane.f32.xlu1 %v2373_v63 }
 0x29d   :  { %v438_v5 = vpop.xlane.xlu0 %437 }
 0x29e   :  { %v485_v41 = vmul.f32 1.442695, %v438_v5  ;;  %vm469_vm0 = vcmp.eq.f32.partialorder %v2210_v42, %v438_v5 }
 0x29f   :  { %v440_v11 = vpop.xlane.xlu1 %439  ;;  %v2384_v15 = vsel %vm469_vm0, -1e+30, %v2210_v42 }
 0x2a0   :  { %3807 = vst [vmem:[#allocation6_spill] sm:$0xff] %v2384_v15  ;;  %1679 = vpow2.f32 %v485_v41  ;;  %v487_v22 = vmul.f32 1.442695, %v440_v11  ;;  %565 = vmax.xlane.f32.xlu0 %v2384_v15  ;;  %vm470_vm1 = vcmp.eq.f32.partialorder %v2219_v43, %v440_v11 }
 0x2a1   :  { %1681 = vpow2.f32 %v369_v4  ;;  %v2393_v25 = vsel %vm470_vm1, -1e+30, %v2219_v43  ;;  %v1678_v4 = vpop.eup %1677 }
 0x2a2   :  { %3808 = vst [vmem:[#allocation7_spill] sm:$0xff] %v2393_v25  ;;  %1683 = vpow2.f32 %v487_v22  ;;  %567 = vmax.xlane.f32.xlu1 %v2393_v25  ;;  %v373_v25 = vmul.f32 1.442695, %v2281_v52 }
 0x2a3   :  { %1685 = vpow2.f32 %v371_v10  ;;  %v379_v10 = vmul.f32 1.442695, %v2270_v51 }
 0x2a4   :  { %1687 = vpow2.f32 %v365_v18  ;;  %v2397_v32 = vpop.xlane.xlu0 %449 }
 0x2a5   :  { %1689 = vpow2.f32 %v367_v23  ;;  %v497_v33 = vmul.f32 1.442695, %v2397_v32  ;;  %vm475_vm15 = vcmp.eq.f32.partialorder %v2232_v9, %v2397_v32 }
 0x2a6   :  { %v2402_v34 = vpop.xlane.xlu1 %451  ;;  %v2408_v3 = vsel %vm475_vm15, -1e+30, %v2232_v9  ;;  %v381_v9 = vmul.f32 1.442695, %v2325_v58 }
 0x2a7   :  { %3809 = vst [vmem:[#allocation8_spill] sm:$0xff] %v2408_v3  ;;  %1691 = vpow2.f32 %v497_v33  ;;  %v499_v41 = vmul.f32 1.442695, %v2402_v34  ;;  %577 = vmax.xlane.f32.xlu0 %v2408_v3  ;;  %vm476_vm14 = vcmp.eq.f32.partialorder %v2243_v46, %v2402_v34  ;;  %v390_v3 = vsel %vm342_vm3, %v1678_v4, 0.0 }
 0x2a8   :  { %1693 = vpow2.f32 %v377_v30  ;;  %v2415_v18 = vpop.xlane.xlu0 %445  ;;  %v2421_v22 = vsel %vm476_vm14, -1e+30, %v2243_v46  ;;  %v389_v30 = vsel %vm341_vm2, %v1676_v1, 0.0 }
 0x2a9   :  { %3810 = vst [vmem:[#allocation9_spill] sm:$0xff] %v2421_v22  ;;  %1695 = vpow2.f32 %v499_v41  ;;  %v493_v23 = vmul.f32 1.442695, %v2415_v18  ;;  %579 = vmax.xlane.f32.xlu1 %v2421_v22  ;;  %vm473_vm13 = vcmp.eq.f32.partialorder %v2254_v48, %v2415_v18 }
 0x2aa   :  { %v1680_v33 = vpop.eup %1679  ;;  %v2434_v15 = vpop.xlane.xlu1 %447  ;;  %v2440_v41 = vsel %vm473_vm13, -1e+30, %v2254_v48 }
 0x2ab   :  { %v1682_v22 = vpop.eup %1681  ;;  %v517_v37 = vsel %vm469_vm0, %v1680_v33, 0.0  ;;  %1697 = vpow2.f32 %v493_v23  ;;  %v495_v35 = vmul.f32 1.442695, %v2434_v15  ;;  %573 = vmax.xlane.f32.xlu0 %v2440_v41  ;;  %vm474_vm2 = vcmp.eq.f32.partialorder %v2265_v50, %v2434_v15 }
 0x2ac   :  { %v1684_v40 = vpop.eup %1683  ;;  %1699 = vpow2.f32 %v379_v10  ;;  %v2449_v39 = vadd.f32 %v517_v37, %v389_v30  ;;  %v2451_v1 = vpop.xlane.xlu0 %457  ;;  %v2457_v42 = vsel %vm474_vm2, -1e+30, %v2265_v50  ;;  %v361_v10 = vmul.f32 1.442695, %v2303_v55 }
 0x2ad   :  { %v1686_v5 = vpop.eup %1685  ;;  %v518_v4 = vsel %vm470_vm1, %v1684_v40, 0.0  ;;  %1701 = vpow2.f32 %v495_v35  ;;  %v505_v23 = vmul.f32 1.442695, %v2451_v1  ;;  %575 = vmax.xlane.f32.xlu1 %v2457_v42  ;;  %vm479_vm3 = vcmp.eq.f32.partialorder %v2276_v12, %v2451_v1 }
 0x2ae   :  { %v1688_v37 = vpop.eup %1687  ;;  %1703 = vpow2.f32 %v373_v25  ;;  %v2466_v33 = vadd.f32 %v518_v4, %v390_v3  ;;  %v2468_v30 = vpop.xlane.xlu1 %459  ;;  %v2474_v43 = vsel %vm479_vm3, -1e+30, %v2276_v12  ;;  %v395_v35 = vsel %vm347_vm4, %v1682_v22, 0.0 }
 0x2af   :  { %v1690_v11 = vpop.eup %1689  ;;  %1705 = vpow2.f32 %v505_v23  ;;  %v507_v25 = vmul.f32 1.442695, %v2468_v30  ;;  %585 = vmax.xlane.f32.xlu0 %v2474_v43  ;;  %vm480_vm0 = vcmp.eq.f32.partialorder %v2287_v53, %v2468_v30  ;;  %v396_v3 = vsel %vm348_vm5, %v1686_v5, 0.0 }
 0x2b0   :  { %1707 = vpow2.f32 %v375_v38  ;;  %v363_v40 = vmul.f32 1.442695, %v2314_v57  ;;  %v2487_v4 = vpop.xlane.xlu0 %453  ;;  %v2493_v7 = vsel %vm480_vm0, -1e+30, %v2287_v53  ;;  %v393_v22 = vsel %vm345_vm6, %v1688_v37, 0.0 }
 0x2b1   :  { %v1692_v8 = vpop.eup %1691  ;;  %1709 = vpow2.f32 %v507_v25  ;;  %v501_v14 = vmul.f32 1.442695, %v2487_v4  ;;  %587 = vmax.xlane.f32.xlu1 %v2493_v7  ;;  %vm477_vm4 = vcmp.eq.f32.partialorder %v2298_v54, %v2487_v4  ;;  %v394_v38 = vsel %vm346_vm7, %v1690_v11, 0.0 }
 0x2b2   :  { %v1694_v44 = vpop.eup %1693  ;;  %1711 = vpow2.f32 %v361_v10  ;;  %v523_v5 = vsel %vm475_vm15, %v1692_v8, 0.0  ;;  %v2508_v16 = vpop.xlane.xlu1 %455  ;;  %v2514_v45 = vsel %vm477_vm4, -1e+30, %v2298_v54  ;;  %v387_v15 = vmul.f32 1.442695, %v2358_v62 }
 0x2b3   :  { %v1696_v23 = vpop.eup %1695  ;;  %v2516_v37 = vadd.f32 %v523_v5, %v395_v35  ;;  %1713 = vpow2.f32 %v501_v14  ;;  %v503_v17 = vmul.f32 1.442695, %v2508_v16  ;;  %581 = vmax.xlane.f32.xlu0 %v2514_v45  ;;  %vm478_vm5 = vcmp.eq.f32.partialorder %v2309_v56, %v2508_v16 }
 0x2b4   :  { %1715 = vpow2.f32 %v363_v40  ;;  %v524_v47 = vsel %vm476_vm14, %v1696_v23, 0.0  ;;  %v2526_v32 = vpop.xlane.xlu0 %441  ;;  %v2532_v10 = vsel %vm478_vm5, -1e+30, %v2309_v56  ;;  %v399_v34 = vsel %vm351_vm8, %v1694_v44, 0.0 }
 0x2b5   :  { %v1698_v11 = vpop.eup %1697  ;;  %v2534_v35 = vadd.f32 %v524_v47, %v396_v3  ;;  %1717 = vpow2.f32 %v503_v17  ;;  %v489_v25 = vmul.f32 1.442695, %v2526_v32  ;;  %583 = vmax.xlane.f32.xlu1 %v2532_v10  ;;  %vm471_vm6 = vcmp.eq.f32.partialorder %v2320_v20, %v2526_v32 }
 0x2b6   :  { %v1700_v46 = vpop.eup %1699  ;;  %v383_v40 = vmul.f32 1.442695, %v2336_v59  ;;  %v521_v3 = vsel %vm473_vm13, %v1698_v11, 0.0  ;;  %v2547_v8 = vpop.xlane.xlu1 %443  ;;  %v2553_v14 = vsel %vm471_vm6, -1e+30, %v2320_v20  ;;  %vm3814_vm15 = vcmp.eq.f32.partialorder %v2193_v6, %v2347_v61 }
 0x2b7   :  { %v1702_v5 = vpop.eup %1701  ;;  %v2555_v23 = vadd.f32 %v521_v3, %v393_v22  ;;  %1719 = vpow2.f32 %v489_v25  ;;  %v491_v19 = vmul.f32 1.442695, %v2547_v8  ;;  %569 = vmax.xlane.f32.xlu0 %v2553_v14  ;;  %vm472_vm7 = vcmp.eq.f32.partialorder %v2331_v21, %v2547_v8 }
 0x2b8   :  { %v1704_v48 = vpop.eup %1703  ;;  %1721 = vpow2.f32 %v381_v9  ;;  %v522_v18 = vsel %vm474_vm2, %v1702_v5, 0.0  ;;  %v2565_v44 = vpop.xlane.xlu0 %461  ;;  %v2571_v22 = vsel %vm472_vm7, -1e+30, %v2331_v21  ;;  %v400_v12 = vsel %vm352_vm9, %v1700_v46, 0.0 }
 0x2b9   :  { %v1706_v17 = vpop.eup %1705  ;;  %v2573_v47 = vadd.f32 %v522_v18, %v394_v38  ;;  %1723 = vpow2.f32 %v491_v19  ;;  %v509_v9 = vmul.f32 1.442695, %v2565_v44  ;;  %571 = vmax.xlane.f32.xlu1 %v2571_v22  ;;  %vm481_vm8 = vcmp.eq.f32.partialorder %v2342_v60, %v2565_v44 }
 0x2ba   :  { %v1708_v50 = vpop.eup %1707  ;;  %1725 = vpow2.f32 %v383_v40  ;;  %v527_v11 = vsel %vm479_vm3, %v1706_v17, 0.0  ;;  %v464_v25 = vpop.xlane.xlu1 %463  ;;  %v2587_v38 = vsel %vm481_vm8, -1e+30, %v2342_v60  ;;  %v397_v51 = vsel %vm349_vm10, %v1704_v48, 0.0 }
 0x2bb   :  { %v1710_v3 = vpop.eup %1709  ;;  %v2589_v5 = vadd.f32 %v527_v11, %v399_v34  ;;  %1727 = vpow2.f32 %v509_v9  ;;  %v511_v19 = vmul.f32 1.442695, %v464_v25  ;;  %589 = vmax.xlane.f32.xlu0 %v2587_v38  ;;  %vm482_vm13 = vcmp.eq.f32.partialorder %v2353_v26, %v464_v25 }
 0x2bc   :  { %v1712_v40 = vpop.eup %1711  ;;  %1729 = vpow2.f32 %v385_v49  ;;  %v528_v1 = vsel %vm480_vm0, %v1710_v3, 0.0  ;;  %v466_v18 = vpop.xlane.xlu0 %465  ;;  %v2602_v34 = vsel %vm482_vm13, -1e+30, %v2353_v26  ;;  %v398_v27 = vsel %vm350_vm11, %v1708_v50, 0.0 }
 0x2bd   :  { %v1714_v17 = vpop.eup %1713  ;;  %v2604_v9 = vadd.f32 %v528_v1, %v400_v12  ;;  %1731 = vpow2.f32 %v511_v19  ;;  %vm483_vm14 = vcmp.eq.f32.partialorder %v2364_v29, %v466_v18  ;;  %v513_v11 = vmul.f32 1.442695, %v466_v18  ;;  %591 = vmax.xlane.f32.xlu1 %v2602_v34  ;;  %v3818_v18 = vld [vmem:[#allocation7_spill] sm:$0xff] }
 0x2be   :  { %v1716_v24 = vpop.eup %1715  ;;  %1733 = vpow2.f32 %v387_v15  ;;  %v525_v53 = vsel %vm477_vm4, %v1714_v17, 0.0  ;;  %v468_v30 = vpop.xlane.xlu1 %467  ;;  %v2617_v46 = vsel %vm483_vm14, -1e+30, %v2364_v29  ;;  %v391_v28 = vsel %vm343_vm12, %v1712_v40, 0.0 }
 0x2bf   :  { %v1718_v49 = vpop.eup %1717  ;;  %v2619_v3 = vadd.f32 %v525_v53, %v397_v51  ;;  %1735 = vpow2.f32 %v513_v11  ;;  %vm484_vm9 = vcmp.eq.f32.partialorder %v2373_v63, %v468_v30  ;;  %v515_v19 = vmul.f32 1.442695, %v468_v30  ;;  %593 = vmax.xlane.f32.xlu0 %v2617_v46  ;;  %v3815_v51 = vld [vmem:[#allocation5_spill] sm:$0xff]  ;;  %v3817_v53 = vld [vmem:[#allocation6_spill] sm:$0xff] }
 0x2c0   :  { %v526_v52 = vsel %vm478_vm5, %v1718_v49, 0.0  ;;  %v2632_v54 = vsel %vm484_vm9, -1e+30, %v2373_v63  ;;  %vm3811_vm10 = vcmp.eq.f32.partialorder %v2181_v36, %v2314_v57  ;;  %vm3812_vm11 = vcmp.eq.f32.partialorder %v2184_v0, %v2325_v58  ;;  %v3819_v49 = vld [vmem:[#allocation8_spill] sm:$0xff] }
 0x2c1   :  { %v1720_v4 = vpop.eup %1719  ;;  %v2634_v48 = vadd.f32 %v526_v52, %v398_v27  ;;  %1737 = vpow2.f32 %v515_v19  ;;  %595 = vmax.xlane.f32.xlu1 %v2632_v54  ;;  %v392_v12 = vsel %vm3811_vm10, %v1716_v24, 0.0  ;;  %vm3813_vm12 = vcmp.eq.f32.partialorder %v2189_v2, %v2336_v59 }
 0x2c2   :  { %v1722_v15 = vpop.eup %1721  ;;  %v519_v13 = vsel %vm471_vm6, %v1720_v4, 0.0  ;;  %vm3816_vm1 = vcmp.eq.f32.partialorder %v3815_v51, %v2358_v62  ;;  %v3820_v4 = vld [vmem:[#allocation9_spill] sm:$0xff] }
 0x2c3   :  { %v1724_v56 = vpop.eup %1723  ;;  %v2643_v16 = vadd.f32 %v519_v13, %v391_v28  ;;  %v401_v55 = vsel %vm3812_vm11, %v1722_v15, 0.0 }
 0x2c4   :  { %v1726_v50 = vpop.eup %1725  ;;  %v520_v1 = vsel %vm472_vm7, %v1724_v56, 0.0 }
 0x2c5   :  { %v1728_v17 = vpop.eup %1727  ;;  %v2651_v11 = vadd.f32 %v520_v1, %v392_v12  ;;  %v402_v57 = vsel %vm3813_vm12, %v1726_v50, 0.0 }
 0x2c6   :  { %v1730_v31 = vpop.eup %1729  ;;  %v529_v20 = vsel %vm481_vm8, %v1728_v17, 0.0 }
 0x2c7   :  { %v1732_v32 = vpop.eup %1731  ;;  %v2659_v40 = vadd.f32 %v529_v20, %v401_v55  ;;  %v403_v0 = vsel %vm3814_vm15, %v1730_v31, 0.0 }
 0x2c8   :  { %v1734_v36 = vpop.eup %1733  ;;  %v530_v21 = vsel %vm482_vm13, %v1732_v32, 0.0 }
 0x2c9   :  { %v1736_v8 = vpop.eup %1735  ;;  %v2666_v24 = vadd.f32 %v530_v21, %v402_v57  ;;  %v404_v2 = vsel %vm3816_vm1, %v1734_v36, 0.0 }
 0x2ca   :  { %v531_v58 = vsel %vm483_vm14, %v1736_v8, 0.0 }
 0x2cb   :  { %v1738_v60 = vpop.eup %1737  ;;  %v2673_v44 = vadd.f32 %v531_v58, %v403_v0 }
 0x2cc   :  { %v532_v59 = vsel %vm484_vm9, %v1738_v60, 0.0 }
 0x2cd   :  { %v2680_v26 = vadd.f32 %v532_v59, %v404_v2 }
 0x32d   :  { %v566_v25 = vpop.xlane.xlu0 %565 }
 0x32e   :  { %vm597_vm2 = vcmp.eq.f32.partialorder %v3817_v53, %v566_v25  ;;  %v613_v6 = vmul.f32 1.442695, %v566_v25 }
 0x32f   :  { %v568_v61 = vpop.xlane.xlu1 %567  ;;  %v2686_v29 = vsel %vm597_vm2, -1e+30, %v3817_v53 }
 0x330   :  { %1739 = vpow2.f32 %v613_v6  ;;  %vm598_vm3 = vcmp.eq.f32.partialorder %v3818_v18, %v568_v61  ;;  %v615_v62 = vmul.f32 1.442695, %v568_v61  ;;  %693 = vmax.xlane.f32.xlu0 %v2686_v29 }
 0x331   :  { %v2693_v63 = vsel %vm598_vm3, -1e+30, %v3818_v18 }
 0x332   :  { %1741 = vpow2.f32 %v615_v62  ;;  %695 = vmax.xlane.f32.xlu1 %v2693_v63 }
 0x334   :  { %v578_v30 = vpop.xlane.xlu0 %577 }
 0x335   :  { %vm603_vm0 = vcmp.eq.f32.partialorder %v3819_v49, %v578_v30  ;;  %v625_v19 = vmul.f32 1.442695, %v578_v30 }
 0x336   :  { %v580_v27 = vpop.xlane.xlu1 %579  ;;  %v2700_v52 = vsel %vm603_vm0, -1e+30, %v3819_v49 }
 0x337   :  { %1743 = vpow2.f32 %v625_v19  ;;  %vm604_vm4 = vcmp.eq.f32.partialorder %v3820_v4, %v580_v27  ;;  %v627_v15 = vmul.f32 1.442695, %v580_v27  ;;  %705 = vmax.xlane.f32.xlu0 %v2700_v52 }
 0x338   :  { %v574_v28 = vpop.xlane.xlu0 %573  ;;  %v2707_v13 = vsel %vm604_vm4, -1e+30, %v3820_v4 }
 0x339   :  { %1745 = vpow2.f32 %v627_v15  ;;  %vm601_vm5 = vcmp.eq.f32.partialorder %v2440_v41, %v574_v28  ;;  %v621_v56 = vmul.f32 1.442695, %v574_v28  ;;  %707 = vmax.xlane.f32.xlu1 %v2707_v13 }
 0x33a   :  { %v1740_v50 = vpop.eup %1739  ;;  %v576_v12 = vpop.xlane.xlu1 %575  ;;  %v2714_v1 = vsel %vm601_vm5, -1e+30, %v2440_v41 }
 0x33b   :  { %v645_v17 = vsel %vm597_vm2, %v1740_v50, 0.0  ;;  %1747 = vpow2.f32 %v621_v56  ;;  %vm602_vm6 = vcmp.eq.f32.partialorder %v2457_v42, %v576_v12  ;;  %v623_v31 = vmul.f32 1.442695, %v576_v12  ;;  %701 = vmax.xlane.f32.xlu0 %v2714_v1 }
 0x33c   :  { %v1742_v55 = vpop.eup %1741  ;;  %v2721_v20 = vadd.f32 %v645_v17, %v2449_v39  ;;  %v586_v32 = vpop.xlane.xlu0 %585  ;;  %v2726_v36 = vsel %vm602_vm6, -1e+30, %v2457_v42 }
 0x33d   :  { %v646_v57 = vsel %vm598_vm3, %v1742_v55, 0.0  ;;  %1749 = vpow2.f32 %v623_v31  ;;  %vm607_vm7 = vcmp.eq.f32.partialorder %v2474_v43, %v586_v32  ;;  %v633_v21 = vmul.f32 1.442695, %v586_v32  ;;  %703 = vmax.xlane.f32.xlu1 %v2726_v36 }
 0x33e   :  { %v2733_v8 = vadd.f32 %v646_v57, %v2466_v33  ;;  %v588_v39 = vpop.xlane.xlu1 %587  ;;  %v2738_v0 = vsel %vm607_vm7, -1e+30, %v2474_v43 }
 0x33f   :  { %1751 = vpow2.f32 %v633_v21  ;;  %vm608_vm8 = vcmp.eq.f32.partialorder %v2493_v7, %v588_v39  ;;  %v635_v58 = vmul.f32 1.442695, %v588_v39  ;;  %713 = vmax.xlane.f32.xlu0 %v2738_v0 }
 0x340   :  { %v582_v60 = vpop.xlane.xlu0 %581  ;;  %v2745_v51 = vsel %vm608_vm8, -1e+30, %v2493_v7 }
 0x341   :  { %v1744_v33 = vpop.eup %1743  ;;  %1753 = vpow2.f32 %v635_v58  ;;  %vm605_vm13 = vcmp.eq.f32.partialorder %v2514_v45, %v582_v60  ;;  %v629_v2 = vmul.f32 1.442695, %v582_v60  ;;  %715 = vmax.xlane.f32.xlu1 %v2745_v51 }
 0x342   :  { %v651_v59 = vsel %vm603_vm0, %v1744_v33, 0.0  ;;  %v2751_v25 = vpop.xlane.xlu1 %583  ;;  %v2756_v53 = vsel %vm605_vm13, -1e+30, %v2514_v45 }
 0x343   :  { %v1746_v6 = vpop.eup %1745  ;;  %v2759_v61 = vadd.f32 %v651_v59, %v2516_v37  ;;  %1755 = vpow2.f32 %v629_v2  ;;  %vm606_vm14 = vcmp.eq.f32.partialorder %v2532_v10, %v2751_v25  ;;  %v631_v18 = vmul.f32 1.442695, %v2751_v25  ;;  %709 = vmax.xlane.f32.xlu0 %v2756_v53 }
 0x344   :  { %v652_v62 = vsel %vm604_vm4, %v1746_v6, 0.0  ;;  %v570_v30 = vpop.xlane.xlu0 %569  ;;  %v2771_v49 = vsel %vm606_vm14, -1e+30, %v2532_v10 }
 0x345   :  { %v1748_v37 = vpop.eup %1747  ;;  %v2774_v19 = vadd.f32 %v652_v62, %v2534_v35  ;;  %1757 = vpow2.f32 %v631_v18  ;;  %vm599_vm9 = vcmp.eq.f32.partialorder %v2553_v14, %v570_v30  ;;  %v617_v15 = vmul.f32 1.442695, %v570_v30  ;;  %711 = vmax.xlane.f32.xlu1 %v2771_v49 }
 0x346   :  { %v649_v27 = vsel %vm601_vm5, %v1748_v37, 0.0  ;;  %v572_v4 = vpop.xlane.xlu1 %571  ;;  %v2783_v56 = vsel %vm599_vm9, -1e+30, %v2553_v14 }
 0x347   :  { %v1750_v50 = vpop.eup %1749  ;;  %v2786_v17 = vadd.f32 %v649_v27, %v2555_v23  ;;  %1759 = vpow2.f32 %v617_v15  ;;  %vm600_vm10 = vcmp.eq.f32.partialorder %v2571_v22, %v572_v4  ;;  %v619_v35 = vmul.f32 1.442695, %v572_v4  ;;  %697 = vmax.xlane.f32.xlu0 %v2783_v56 }
 0x348   :  { %v650_v41 = vsel %vm602_vm6, %v1750_v50, 0.0  ;;  %v590_v28 = vpop.xlane.xlu0 %589  ;;  %v2795_v31 = vsel %vm600_vm10, -1e+30, %v2571_v22 }
 0x349   :  { %v1752_v55 = vpop.eup %1751  ;;  %v2798_v57 = vadd.f32 %v650_v41, %v2573_v47  ;;  %1761 = vpow2.f32 %v619_v35  ;;  %vm609_vm11 = vcmp.eq.f32.partialorder %v2587_v38, %v590_v28  ;;  %v637_v23 = vmul.f32 1.442695, %v590_v28  ;;  %699 = vmax.xlane.f32.xlu1 %v2795_v31 }
 0x34a   :  { %v655_v42 = vsel %vm607_vm7, %v1752_v55, 0.0  ;;  %v592_v12 = vpop.xlane.xlu1 %591  ;;  %v2807_v21 = vsel %vm609_vm11, -1e+30, %v2587_v38 }
 0x34b   :  { %v1754_v58 = vpop.eup %1753  ;;  %v2810_v33 = vadd.f32 %v655_v42, %v2589_v5  ;;  %1763 = vpow2.f32 %v637_v23  ;;  %vm610_vm12 = vcmp.eq.f32.partialorder %v2602_v34, %v592_v12  ;;  %v639_v47 = vmul.f32 1.442695, %v592_v12  ;;  %717 = vmax.xlane.f32.xlu0 %v2807_v21 }
 0x34c   :  { %v656_v43 = vsel %vm608_vm8, %v1754_v58, 0.0  ;;  %v594_v32 = vpop.xlane.xlu0 %593  ;;  %v2819_v2 = vsel %vm610_vm12, -1e+30, %v2602_v34 }
 0x34d   :  { %v1756_v59 = vpop.eup %1755  ;;  %v2822_v6 = vadd.f32 %v656_v43, %v2604_v9  ;;  %1765 = vpow2.f32 %v639_v47  ;;  %vm611_vm15 = vcmp.eq.f32.partialorder %v2617_v46, %v594_v32  ;;  %v641_v5 = vmul.f32 1.442695, %v594_v32  ;;  %719 = vmax.xlane.f32.xlu1 %v2819_v2 }
 0x34e   :  { %v653_v7 = vsel %vm605_vm13, %v1756_v59, 0.0  ;;  %v596_v39 = vpop.xlane.xlu1 %595  ;;  %v2831_v18 = vsel %vm611_vm15, -1e+30, %v2617_v46 }
 0x34f   :  { %v1758_v62 = vpop.eup %1757  ;;  %v2834_v37 = vadd.f32 %v653_v7, %v2619_v3  ;;  %1767 = vpow2.f32 %v641_v5  ;;  %vm612_vm1 = vcmp.eq.f32.partialorder %v2632_v54, %v596_v39  ;;  %v643_v9 = vmul.f32 1.442695, %v596_v39  ;;  %721 = vmax.xlane.f32.xlu0 %v2831_v18 }
 0x350   :  { %v654_v45 = vsel %vm606_vm14, %v1758_v62, 0.0  ;;  %v2844_v60 = vsel %vm612_vm1, -1e+30, %v2632_v54 }
 0x351   :  { %v1760_v15 = vpop.eup %1759  ;;  %v2847_v27 = vadd.f32 %v654_v45, %v2634_v48  ;;  %1769 = vpow2.f32 %v643_v9  ;;  %723 = vmax.xlane.f32.xlu1 %v2844_v60 }
 0x352   :  { %v647_v3 = vsel %vm599_vm9, %v1760_v15, 0.0 }
 0x353   :  { %v1762_v50 = vpop.eup %1761  ;;  %v2853_v35 = vadd.f32 %v647_v3, %v2643_v16 }
 0x354   :  { %v648_v10 = vsel %vm600_vm10, %v1762_v50, 0.0 }
 0x355   :  { %v1764_v25 = vpop.eup %1763  ;;  %v2858_v41 = vadd.f32 %v648_v10, %v2651_v11 }
 0x356   :  { %v657_v48 = vsel %vm609_vm11, %v1764_v25, 0.0 }
 0x357   :  { %v1766_v55 = vpop.eup %1765  ;;  %v2863_v23 = vadd.f32 %v657_v48, %v2659_v40 }
 0x358   :  { %v658_v14 = vsel %vm610_vm12, %v1766_v55, 0.0 }
 0x359   :  { %v1768_v30 = vpop.eup %1767  ;;  %v2868_v16 = vadd.f32 %v658_v14, %v2666_v24 }
 0x35a   :  { %v659_v22 = vsel %vm611_vm15, %v1768_v30, 0.0 }
 0x35b   :  { %v1770_v4 = vpop.eup %1769  ;;  %v2873_v11 = vadd.f32 %v659_v22, %v2673_v44 }
 0x35c   :  { %v660_v38 = vsel %vm612_vm1, %v1770_v4, 0.0 }
 0x35d   :  { %v2878_v40 = vadd.f32 %v660_v38, %v2680_v26 }
 0x3bd   :  { %v694_v28 = vpop.xlane.xlu0 %693 }
 0x3be   :  { %vm725_vm2 = vcmp.eq.f32.partialorder %v2686_v29, %v694_v28  ;;  %v741_v34 = vmul.f32 1.442695, %v694_v28 }
 0x3bf   :  { %v696_v42 = vpop.xlane.xlu1 %695  ;;  %v2884_v46 = vsel %vm725_vm2, -1e+30, %v2686_v29 }
 0x3c0   :  { %1771 = vpow2.f32 %v741_v34  ;;  %vm726_vm3 = vcmp.eq.f32.partialorder %v2693_v63, %v696_v42  ;;  %v743_v24 = vmul.f32 1.442695, %v696_v42  ;;  %821 = vmax.xlane.f32.xlu0 %v2884_v46 }
 0x3c1   :  { %v2891_v54 = vsel %vm726_vm3, -1e+30, %v2693_v63 }
 0x3c2   :  { %1773 = vpow2.f32 %v743_v24  ;;  %823 = vmax.xlane.f32.xlu1 %v2891_v54 }
 0x3c4   :  { %v706_v44 = vpop.xlane.xlu0 %705 }
 0x3c5   :  { %vm731_vm0 = vcmp.eq.f32.partialorder %v2700_v52, %v706_v44  ;;  %v753_v26 = vmul.f32 1.442695, %v706_v44 }
 0x3c6   :  { %v708_v12 = vpop.xlane.xlu1 %707  ;;  %v2898_v58 = vsel %vm731_vm0, -1e+30, %v2700_v52 }
 0x3c7   :  { %1775 = vpow2.f32 %v753_v26  ;;  %vm732_vm4 = vcmp.eq.f32.partialorder %v2707_v13, %v708_v12  ;;  %v755_v47 = vmul.f32 1.442695, %v708_v12  ;;  %833 = vmax.xlane.f32.xlu0 %v2898_v58 }
 0x3c8   :  { %v702_v43 = vpop.xlane.xlu0 %701  ;;  %v2905_v32 = vsel %vm732_vm4, -1e+30, %v2707_v13 }
 0x3c9   :  { %1777 = vpow2.f32 %v755_v47  ;;  %vm729_vm5 = vcmp.eq.f32.partialorder %v2714_v1, %v702_v43  ;;  %v749_v59 = vmul.f32 1.442695, %v702_v43  ;;  %835 = vmax.xlane.f32.xlu1 %v2905_v32 }
 0x3ca   :  { %v1772_v5 = vpop.eup %1771  ;;  %v704_v7 = vpop.xlane.xlu1 %703  ;;  %v2912_v39 = vsel %vm729_vm5, -1e+30, %v2714_v1 }
 0x3cb   :  { %v773_v62 = vsel %vm725_vm2, %v1772_v5, 0.0  ;;  %1779 = vpow2.f32 %v749_v59  ;;  %vm730_vm6 = vcmp.eq.f32.partialorder %v2726_v36, %v704_v7  ;;  %v751_v9 = vmul.f32 1.442695, %v704_v7  ;;  %829 = vmax.xlane.f32.xlu0 %v2912_v39 }
 0x3cc   :  { %v1774_v45 = vpop.eup %1773  ;;  %v2919_v15 = vadd.f32 %v773_v62, %v2721_v20  ;;  %v714_v3 = vpop.xlane.xlu0 %713  ;;  %v2924_v50 = vsel %vm730_vm6, -1e+30, %v2726_v36 }
 0x3cd   :  { %v774_v29 = vsel %vm726_vm3, %v1774_v45, 0.0  ;;  %1781 = vpow2.f32 %v751_v9  ;;  %vm735_vm7 = vcmp.eq.f32.partialorder %v2738_v0, %v714_v3  ;;  %v761_v10 = vmul.f32 1.442695, %v714_v3  ;;  %831 = vmax.xlane.f32.xlu1 %v2924_v50 }
 0x3ce   :  { %v2931_v25 = vadd.f32 %v774_v29, %v2733_v8  ;;  %v716_v20 = vpop.xlane.xlu1 %715  ;;  %v2936_v48 = vsel %vm735_vm7, -1e+30, %v2738_v0 }
 0x3cf   :  { %1783 = vpow2.f32 %v761_v10  ;;  %vm736_vm8 = vcmp.eq.f32.partialorder %v2745_v51, %v716_v20  ;;  %v763_v63 = vmul.f32 1.442695, %v716_v20  ;;  %841 = vmax.xlane.f32.xlu0 %v2936_v48 }
 0x3d0   :  { %v710_v55 = vpop.xlane.xlu0 %709  ;;  %v2943_v14 = vsel %vm736_vm8, -1e+30, %v2745_v51 }
 0x3d1   :  { %v1776_v8 = vpop.eup %1775  ;;  %1785 = vpow2.f32 %v763_v63  ;;  %vm733_vm13 = vcmp.eq.f32.partialorder %v2756_v53, %v710_v55  ;;  %v757_v30 = vmul.f32 1.442695, %v710_v55  ;;  %843 = vmax.xlane.f32.xlu1 %v2943_v14 }
 0x3d2   :  { %v779_v22 = vsel %vm731_vm0, %v1776_v8, 0.0  ;;  %v2949_v4 = vpop.xlane.xlu1 %711  ;;  %v2954_v38 = vsel %vm733_vm13, -1e+30, %v2756_v53 }
 0x3d3   :  { %v1778_v28 = vpop.eup %1777  ;;  %v2957_v34 = vadd.f32 %v779_v22, %v2759_v61  ;;  %1787 = vpow2.f32 %v757_v30  ;;  %vm734_vm14 = vcmp.eq.f32.partialorder %v2771_v49, %v2949_v4  ;;  %v759_v42 = vmul.f32 1.442695, %v2949_v4  ;;  %837 = vmax.xlane.f32.xlu0 %v2954_v38 }
 0x3d4   :  { %v780_v52 = vsel %vm732_vm4, %v1778_v28, 0.0  ;;  %v698_v24 = vpop.xlane.xlu0 %697  ;;  %v2969_v44 = vsel %vm734_vm14, -1e+30, %v2771_v49 }
 0x3d5   :  { %v1780_v61 = vpop.eup %1779  ;;  %v2972_v26 = vadd.f32 %v780_v52, %v2774_v19  ;;  %1789 = vpow2.f32 %v759_v42  ;;  %vm727_vm9 = vcmp.eq.f32.partialorder %v2783_v56, %v698_v24  ;;  %v745_v47 = vmul.f32 1.442695, %v698_v24  ;;  %839 = vmax.xlane.f32.xlu1 %v2969_v44 }
 0x3d6   :  { %v777_v13 = vsel %vm729_vm5, %v1780_v61, 0.0  ;;  %v700_v12 = vpop.xlane.xlu1 %699  ;;  %v2981_v59 = vsel %vm727_vm9, -1e+30, %v2783_v56 }
 0x3d7   :  { %v1782_v5 = vpop.eup %1781  ;;  %v2984_v62 = vadd.f32 %v777_v13, %v2786_v17  ;;  %1791 = vpow2.f32 %v745_v47  ;;  %vm728_vm10 = vcmp.eq.f32.partialorder %v2795_v31, %v700_v12  ;;  %v747_v19 = vmul.f32 1.442695, %v700_v12  ;;  %825 = vmax.xlane.f32.xlu0 %v2981_v59 }
 0x3d8   :  { %v778_v1 = vsel %vm730_vm6, %v1782_v5, 0.0  ;;  %v718_v43 = vpop.xlane.xlu0 %717  ;;  %v2993_v9 = vsel %vm728_vm10, -1e+30, %v2795_v31 }
 0x3d9   :  { %v1784_v45 = vpop.eup %1783  ;;  %v2996_v29 = vadd.f32 %v778_v1, %v2798_v57  ;;  %1793 = vpow2.f32 %v747_v19  ;;  %vm737_vm11 = vcmp.eq.f32.partialorder %v2807_v21, %v718_v43  ;;  %v765_v17 = vmul.f32 1.442695, %v718_v43  ;;  %827 = vmax.xlane.f32.xlu1 %v2993_v9 }
 0x3da   :  { %v783_v36 = vsel %vm735_vm7, %v1784_v45, 0.0  ;;  %v720_v7 = vpop.xlane.xlu1 %719  ;;  %v3005_v10 = vsel %vm737_vm11, -1e+30, %v2807_v21 }
 0x3db   :  { %v1786_v63 = vpop.eup %1785  ;;  %v3008_v8 = vadd.f32 %v783_v36, %v2810_v33  ;;  %1795 = vpow2.f32 %v765_v17  ;;  %vm738_vm12 = vcmp.eq.f32.partialorder %v2819_v2, %v720_v7  ;;  %v767_v57 = vmul.f32 1.442695, %v720_v7  ;;  %845 = vmax.xlane.f32.xlu0 %v3005_v10 }
 0x3dc   :  { %v784_v0 = vsel %vm736_vm8, %v1786_v63, 0.0  ;;  %v722_v3 = vpop.xlane.xlu0 %721  ;;  %v3017_v30 = vsel %vm738_vm12, -1e+30, %v2819_v2 }
 0x3dd   :  { %v1788_v22 = vpop.eup %1787  ;;  %v3020_v28 = vadd.f32 %v784_v0, %v2822_v6  ;;  %1797 = vpow2.f32 %v767_v57  ;;  %vm739_vm15 = vcmp.eq.f32.partialorder %v2831_v18, %v722_v3  ;;  %v769_v33 = vmul.f32 1.442695, %v722_v3  ;;  %847 = vmax.xlane.f32.xlu1 %v3017_v30 }
 0x3de   :  { %v781_v51 = vsel %vm733_vm13, %v1788_v22, 0.0  ;;  %v724_v20 = vpop.xlane.xlu1 %723  ;;  %v3029_v42 = vsel %vm739_vm15, -1e+30, %v2831_v18 }
 0x3df   :  { %v1790_v52 = vpop.eup %1789  ;;  %v3032_v61 = vadd.f32 %v781_v51, %v2834_v37  ;;  %1799 = vpow2.f32 %v769_v33  ;;  %vm740_vm1 = vcmp.eq.f32.partialorder %v2844_v60, %v724_v20  ;;  %v771_v6 = vmul.f32 1.442695, %v724_v20  ;;  %849 = vmax.xlane.f32.xlu0 %v3029_v42 }
 0x3e0   :  { %v782_v53 = vsel %vm734_vm14, %v1790_v52, 0.0  ;;  %v3042_v55 = vsel %vm740_vm1, -1e+30, %v2844_v60 }
 0x3e1   :  { %v1792_v47 = vpop.eup %1791  ;;  %v3045_v13 = vadd.f32 %v782_v53, %v2847_v27  ;;  %1801 = vpow2.f32 %v771_v6  ;;  %851 = vmax.xlane.f32.xlu1 %v3042_v55 }
 0x3e2   :  { %v775_v37 = vsel %vm727_vm9, %v1792_v47, 0.0 }
 0x3e3   :  { %v1794_v5 = vpop.eup %1793  ;;  %v3051_v19 = vadd.f32 %v775_v37, %v2853_v35 }
 0x3e4   :  { %v776_v49 = vsel %vm728_vm10, %v1794_v5, 0.0 }
 0x3e5   :  { %v1796_v4 = vpop.eup %1795  ;;  %v3056_v1 = vadd.f32 %v776_v49, %v2858_v41 }
 0x3e6   :  { %v785_v27 = vsel %vm737_vm11, %v1796_v4, 0.0 }
 0x3e7   :  { %v1798_v45 = vpop.eup %1797  ;;  %v3061_v17 = vadd.f32 %v785_v27, %v2863_v23 }
 0x3e8   :  { %v786_v56 = vsel %vm738_vm12, %v1798_v45, 0.0 }
 0x3e9   :  { %v1800_v24 = vpop.eup %1799  ;;  %v3066_v35 = vadd.f32 %v786_v56, %v2868_v16 }
 0x3ea   :  { %v787_v31 = vsel %vm739_vm15, %v1800_v24, 0.0 }
 0x3eb   :  { %v1802_v12 = vpop.eup %1801  ;;  %v3071_v41 = vadd.f32 %v787_v31, %v2873_v11 }
 0x3ec   :  { %v788_v21 = vsel %vm740_vm1, %v1802_v12, 0.0 }
 0x3ed   :  { %v3076_v23 = vadd.f32 %v788_v21, %v2878_v40 }
 0x44d   :  { %v822_v43 = vpop.xlane.xlu0 %821 }
 0x44e   :  { %vm853_vm2 = vcmp.eq.f32.partialorder %v2884_v46, %v822_v43  ;;  %v869_v2 = vmul.f32 1.442695, %v822_v43 }
 0x44f   :  { %v824_v36 = vpop.xlane.xlu1 %823  ;;  %v3082_v18 = vsel %vm853_vm2, -1e+30, %v2884_v46 }
 0x450   :  { %1803 = vpow2.f32 %v869_v2  ;;  %vm854_vm3 = vcmp.eq.f32.partialorder %v2891_v54, %v824_v36  ;;  %v871_v16 = vmul.f32 1.442695, %v824_v36  ;;  %949 = vmax.xlane.f32.xlu0 %v3082_v18 }
 0x451   :  { %v3089_v60 = vsel %vm854_vm3, -1e+30, %v2891_v54 }
 0x452   :  { %1805 = vpow2.f32 %v871_v16  ;;  %951 = vmax.xlane.f32.xlu1 %v3089_v60 }
 0x454   :  { %v834_v11 = vpop.xlane.xlu0 %833 }
 0x455   :  { %vm859_vm0 = vcmp.eq.f32.partialorder %v2898_v58, %v834_v11  ;;  %v881_v40 = vmul.f32 1.442695, %v834_v11 }
 0x456   :  { %v836_v7 = vpop.xlane.xlu1 %835  ;;  %v3096_v63 = vsel %vm859_vm0, -1e+30, %v2898_v58 }
 0x457   :  { %1807 = vpow2.f32 %v881_v40  ;;  %vm860_vm4 = vcmp.eq.f32.partialorder %v2905_v32, %v836_v7  ;;  %v883_v57 = vmul.f32 1.442695, %v836_v7  ;;  %961 = vmax.xlane.f32.xlu0 %v3096_v63 }
 0x458   :  { %v830_v0 = vpop.xlane.xlu0 %829  ;;  %v3103_v3 = vsel %vm860_vm4, -1e+30, %v2905_v32 }
 0x459   :  { %1809 = vpow2.f32 %v883_v57  ;;  %vm857_vm5 = vcmp.eq.f32.partialorder %v2912_v39, %v830_v0  ;;  %v877_v22 = vmul.f32 1.442695, %v830_v0  ;;  %963 = vmax.xlane.f32.xlu1 %v3103_v3 }
 0x45a   :  { %v1804_v33 = vpop.eup %1803  ;;  %v832_v51 = vpop.xlane.xlu1 %831  ;;  %v3110_v20 = vsel %vm857_vm5, -1e+30, %v2912_v39 }
 0x45b   :  { %v901_v52 = vsel %vm853_vm2, %v1804_v33, 0.0  ;;  %1811 = vpow2.f32 %v877_v22  ;;  %vm858_vm6 = vcmp.eq.f32.partialorder %v2924_v50, %v832_v51  ;;  %v879_v6 = vmul.f32 1.442695, %v832_v51  ;;  %957 = vmax.xlane.f32.xlu0 %v3110_v20 }
 0x45c   :  { %v1806_v53 = vpop.eup %1805  ;;  %v3117_v47 = vadd.f32 %v901_v52, %v2919_v15  ;;  %v842_v37 = vpop.xlane.xlu0 %841  ;;  %v3122_v5 = vsel %vm858_vm6, -1e+30, %v2924_v50 }
 0x45d   :  { %v902_v46 = vsel %vm854_vm3, %v1806_v53, 0.0  ;;  %1813 = vpow2.f32 %v879_v6  ;;  %vm863_vm7 = vcmp.eq.f32.partialorder %v2936_v48, %v842_v37  ;;  %v889_v49 = vmul.f32 1.442695, %v842_v37  ;;  %959 = vmax.xlane.f32.xlu1 %v3122_v5 }
 0x45e   :  { %v3129_v4 = vadd.f32 %v902_v46, %v2931_v25  ;;  %v844_v15 = vpop.xlane.xlu1 %843  ;;  %v3134_v27 = vsel %vm863_vm7, -1e+30, %v2936_v48 }
 0x45f   :  { %1815 = vpow2.f32 %v889_v49  ;;  %vm864_vm8 = vcmp.eq.f32.partialorder %v2943_v14, %v844_v15  ;;  %v891_v54 = vmul.f32 1.442695, %v844_v15  ;;  %969 = vmax.xlane.f32.xlu0 %v3134_v27 }
 0x460   :  { %v838_v45 = vpop.xlane.xlu0 %837  ;;  %v3141_v56 = vsel %vm864_vm8, -1e+30, %v2943_v14 }
 0x461   :  { %v1808_v25 = vpop.eup %1807  ;;  %1817 = vpow2.f32 %v891_v54  ;;  %vm861_vm13 = vcmp.eq.f32.partialorder %v2954_v38, %v838_v45  ;;  %v885_v24 = vmul.f32 1.442695, %v838_v45  ;;  %971 = vmax.xlane.f32.xlu1 %v3141_v56 }
 0x462   :  { %v907_v31 = vsel %vm859_vm0, %v1808_v25, 0.0  ;;  %v3147_v12 = vpop.xlane.xlu1 %839  ;;  %v3152_v21 = vsel %vm861_vm13, -1e+30, %v2954_v38 }
 0x463   :  { %v1810_v43 = vpop.eup %1809  ;;  %v3155_v2 = vadd.f32 %v907_v31, %v2957_v34  ;;  %1819 = vpow2.f32 %v885_v24  ;;  %vm862_vm14 = vcmp.eq.f32.partialorder %v2969_v44, %v3147_v12  ;;  %v887_v36 = vmul.f32 1.442695, %v3147_v12  ;;  %965 = vmax.xlane.f32.xlu0 %v3152_v21 }
 0x464   :  { %v908_v58 = vsel %vm860_vm4, %v1810_v43, 0.0  ;;  %v826_v16 = vpop.xlane.xlu0 %825  ;;  %v3167_v11 = vsel %vm862_vm14, -1e+30, %v2969_v44 }
 0x465   :  { %v1812_v34 = vpop.eup %1811  ;;  %v3170_v40 = vadd.f32 %v908_v58, %v2972_v26  ;;  %1821 = vpow2.f32 %v887_v36  ;;  %vm855_vm9 = vcmp.eq.f32.partialorder %v2981_v59, %v826_v16  ;;  %v873_v57 = vmul.f32 1.442695, %v826_v16  ;;  %967 = vmax.xlane.f32.xlu1 %v3167_v11 }
 0x466   :  { %v905_v32 = vsel %vm857_vm5, %v1812_v34, 0.0  ;;  %v828_v7 = vpop.xlane.xlu1 %827  ;;  %v3179_v22 = vsel %vm855_vm9, -1e+30, %v2981_v59 }
 0x467   :  { %v1814_v33 = vpop.eup %1813  ;;  %v3182_v52 = vadd.f32 %v905_v32, %v2984_v62  ;;  %1823 = vpow2.f32 %v873_v57  ;;  %vm856_vm10 = vcmp.eq.f32.partialorder %v2993_v9, %v828_v7  ;;  %v875_v26 = vmul.f32 1.442695, %v828_v7  ;;  %953 = vmax.xlane.f32.xlu0 %v3179_v22 }
 0x468   :  { %v906_v39 = vsel %vm858_vm6, %v1814_v33, 0.0  ;;  %v846_v0 = vpop.xlane.xlu0 %845  ;;  %v3191_v6 = vsel %vm856_vm10, -1e+30, %v2993_v9 }
 0x469   :  { %v1816_v53 = vpop.eup %1815  ;;  %v3194_v46 = vadd.f32 %v906_v39, %v2996_v29  ;;  %1825 = vpow2.f32 %v875_v26  ;;  %vm865_vm11 = vcmp.eq.f32.partialorder %v3005_v10, %v846_v0  ;;  %v893_v62 = vmul.f32 1.442695, %v846_v0  ;;  %955 = vmax.xlane.f32.xlu1 %v3191_v6 }
 0x46a   :  { %v911_v50 = vsel %vm863_vm7, %v1816_v53, 0.0  ;;  %v848_v51 = vpop.xlane.xlu1 %847  ;;  %v3203_v49 = vsel %vm865_vm11, -1e+30, %v3005_v10 }
 0x46b   :  { %v1818_v54 = vpop.eup %1817  ;;  %v3206_v25 = vadd.f32 %v911_v50, %v3008_v8  ;;  %1827 = vpow2.f32 %v893_v62  ;;  %vm866_vm12 = vcmp.eq.f32.partialorder %v3017_v30, %v848_v51  ;;  %v895_v29 = vmul.f32 1.442695, %v848_v51  ;;  %973 = vmax.xlane.f32.xlu0 %v3203_v49 }
 0x46c   :  { %v912_v48 = vsel %vm864_vm8, %v1818_v54, 0.0  ;;  %v850_v37 = vpop.xlane.xlu0 %849  ;;  %v3215_v24 = vsel %vm866_vm12, -1e+30, %v3017_v30 }
 0x46d   :  { %v1820_v31 = vpop.eup %1819  ;;  %v3218_v43 = vadd.f32 %v912_v48, %v3020_v28  ;;  %1829 = vpow2.f32 %v895_v29  ;;  %vm867_vm15 = vcmp.eq.f32.partialorder %v3029_v42, %v850_v37  ;;  %v897_v8 = vmul.f32 1.442695, %v850_v37  ;;  %975 = vmax.xlane.f32.xlu1 %v3215_v24 }
 0x46e   :  { %v909_v14 = vsel %vm861_vm13, %v1820_v31, 0.0  ;;  %v852_v15 = vpop.xlane.xlu1 %851  ;;  %v3227_v36 = vsel %vm867_vm15, -1e+30, %v3029_v42 }
 0x46f   :  { %v1822_v58 = vpop.eup %1821  ;;  %v3230_v34 = vadd.f32 %v909_v14, %v3032_v61  ;;  %1831 = vpow2.f32 %v897_v8  ;;  %vm868_vm1 = vcmp.eq.f32.partialorder %v3042_v55, %v852_v15  ;;  %v899_v28 = vmul.f32 1.442695, %v852_v15  ;;  %977 = vmax.xlane.f32.xlu0 %v3227_v36 }
 0x470   :  { %v910_v38 = vsel %vm862_vm14, %v1822_v58, 0.0  ;;  %v3240_v45 = vsel %vm868_vm1, -1e+30, %v3042_v55 }
 0x471   :  { %v1824_v57 = vpop.eup %1823  ;;  %v3243_v32 = vadd.f32 %v910_v38, %v3045_v13  ;;  %1833 = vpow2.f32 %v899_v28  ;;  %979 = vmax.xlane.f32.xlu1 %v3240_v45 }
 0x472   :  { %v903_v61 = vsel %vm855_vm9, %v1824_v57, 0.0 }
 0x473   :  { %v1826_v33 = vpop.eup %1825  ;;  %v3249_v26 = vadd.f32 %v903_v61, %v3051_v19 }
 0x474   :  { %v904_v44 = vsel %vm856_vm10, %v1826_v33, 0.0 }
 0x475   :  { %v1828_v12 = vpop.eup %1827  ;;  %v3254_v39 = vadd.f32 %v904_v44, %v3056_v1 }
 0x476   :  { %v913_v13 = vsel %vm865_vm11, %v1828_v12, 0.0 }
 0x477   :  { %v1830_v53 = vpop.eup %1829  ;;  %v3259_v62 = vadd.f32 %v913_v13, %v3061_v17 }
 0x478   :  { %v914_v59 = vsel %vm866_vm12, %v1830_v53, 0.0 }
 0x479   :  { %v1832_v16 = vpop.eup %1831  ;;  %v3264_v19 = vadd.f32 %v914_v59, %v3066_v35 }
 0x47a   :  { %v915_v9 = vsel %vm867_vm15, %v1832_v16, 0.0 }
 0x47b   :  { %v1834_v7 = vpop.eup %1833  ;;  %v3269_v1 = vadd.f32 %v915_v9, %v3071_v41 }
 0x47c   :  { %v916_v10 = vsel %vm868_vm1, %v1834_v7, 0.0 }
 0x47d   :  { %v3274_v17 = vadd.f32 %v916_v10, %v3076_v23 }
 0x4dd   :  { %v950_v0 = vpop.xlane.xlu0 %949 }
 0x4de   :  { %vm981_vm2 = vcmp.eq.f32.partialorder %v3082_v18, %v950_v0  ;;  %v997_v30 = vmul.f32 1.442695, %v950_v0 }
 0x4df   :  { %v952_v50 = vpop.xlane.xlu1 %951  ;;  %v3280_v42 = vsel %vm981_vm2, -1e+30, %v3082_v18 }
 0x4e0   :  { %1835 = vpow2.f32 %v997_v30  ;;  %vm982_vm3 = vcmp.eq.f32.partialorder %v3089_v60, %v952_v50  ;;  %v999_v35 = vmul.f32 1.442695, %v952_v50  ;;  %1077 = vmax.xlane.f32.xlu0 %v3280_v42 }
 0x4e1   :  { %v3287_v55 = vsel %vm982_vm3, -1e+30, %v3089_v60 }
 0x4e2   :  { %1837 = vpow2.f32 %v999_v35  ;;  %1079 = vmax.xlane.f32.xlu1 %v3287_v55 }
 0x4e4   :  { %v962_v41 = vpop.xlane.xlu0 %961 }
 0x4e5   :  { %vm987_vm0 = vcmp.eq.f32.partialorder %v3096_v63, %v962_v41  ;;  %v1009_v23 = vmul.f32 1.442695, %v962_v41 }
 0x4e6   :  { %v964_v51 = vpop.xlane.xlu1 %963  ;;  %v3294_v54 = vsel %vm987_vm0, -1e+30, %v3096_v63 }
 0x4e7   :  { %1839 = vpow2.f32 %v1009_v23  ;;  %vm988_vm4 = vcmp.eq.f32.partialorder %v3103_v3, %v964_v51  ;;  %v1011_v29 = vmul.f32 1.442695, %v964_v51  ;;  %1089 = vmax.xlane.f32.xlu0 %v3294_v54 }
 0x4e8   :  { %v958_v48 = vpop.xlane.xlu0 %957  ;;  %v3301_v37 = vsel %vm988_vm4, -1e+30, %v3103_v3 }
 0x4e9   :  { %1841 = vpow2.f32 %v1011_v29  ;;  %vm985_vm5 = vcmp.eq.f32.partialorder %v3110_v20, %v958_v48  ;;  %v1005_v31 = vmul.f32 1.442695, %v958_v48  ;;  %1091 = vmax.xlane.f32.xlu1 %v3301_v37 }
 0x4ea   :  { %v1836_v8 = vpop.eup %1835  ;;  %v960_v14 = vpop.xlane.xlu1 %959  ;;  %v3308_v15 = vsel %vm985_vm5, -1e+30, %v3110_v20 }
 0x4eb   :  { %v1029_v58 = vsel %vm981_vm2, %v1836_v8, 0.0  ;;  %1843 = vpow2.f32 %v1005_v31  ;;  %vm986_vm6 = vcmp.eq.f32.partialorder %v3122_v5, %v960_v14  ;;  %v1007_v28 = vmul.f32 1.442695, %v960_v14  ;;  %1085 = vmax.xlane.f32.xlu0 %v3308_v15 }
 0x4ec   :  { %v1838_v38 = vpop.eup %1837  ;;  %v3315_v57 = vadd.f32 %v1029_v58, %v3117_v47  ;;  %v970_v61 = vpop.xlane.xlu0 %969  ;;  %v3320_v33 = vsel %vm986_vm6, -1e+30, %v3122_v5 }
 0x4ed   :  { %v1030_v18 = vsel %vm982_vm3, %v1838_v38, 0.0  ;;  %1845 = vpow2.f32 %v1007_v28  ;;  %vm991_vm7 = vcmp.eq.f32.partialorder %v3134_v27, %v970_v61  ;;  %v1017_v44 = vmul.f32 1.442695, %v970_v61  ;;  %1087 = vmax.xlane.f32.xlu1 %v3320_v33 }
 0x4ee   :  { %v3327_v12 = vadd.f32 %v1030_v18, %v3129_v4  ;;  %v972_v47 = vpop.xlane.xlu1 %971  ;;  %v3332_v13 = vsel %vm991_vm7, -1e+30, %v3134_v27 }
 0x4ef   :  { %1847 = vpow2.f32 %v1017_v44  ;;  %vm992_vm8 = vcmp.eq.f32.partialorder %v3141_v56, %v972_v47  ;;  %v1019_v60 = vmul.f32 1.442695, %v972_v47  ;;  %1097 = vmax.xlane.f32.xlu0 %v3332_v13 }
 0x4f0   :  { %v966_v53 = vpop.xlane.xlu0 %965  ;;  %v3339_v59 = vsel %vm992_vm8, -1e+30, %v3141_v56 }
 0x4f1   :  { %v1840_v4 = vpop.eup %1839  ;;  %1849 = vpow2.f32 %v1019_v60  ;;  %vm989_vm13 = vcmp.eq.f32.partialorder %v3152_v21, %v966_v53  ;;  %v1013_v16 = vmul.f32 1.442695, %v966_v53  ;;  %1099 = vmax.xlane.f32.xlu1 %v3339_v59 }
 0x4f2   :  { %v1035_v9 = vsel %vm987_vm0, %v1840_v4, 0.0  ;;  %v3345_v7 = vpop.xlane.xlu1 %967  ;;  %v3350_v10 = vsel %vm989_vm13, -1e+30, %v3152_v21 }
 0x4f3   :  { %v1842_v0 = vpop.eup %1841  ;;  %v3353_v30 = vadd.f32 %v1035_v9, %v3155_v2  ;;  %1851 = vpow2.f32 %v1013_v16  ;;  %vm990_vm14 = vcmp.eq.f32.partialorder %v3167_v11, %v3345_v7  ;;  %v1015_v50 = vmul.f32 1.442695, %v3345_v7  ;;  %1093 = vmax.xlane.f32.xlu0 %v3350_v10 }
 0x4f4   :  { %v1036_v63 = vsel %vm988_vm4, %v1842_v0, 0.0  ;;  %v954_v35 = vpop.xlane.xlu0 %953  ;;  %v3365_v41 = vsel %vm990_vm14, -1e+30, %v3167_v11 }
 0x4f5   :  { %v1844_v2 = vpop.eup %1843  ;;  %v3368_v23 = vadd.f32 %v1036_v63, %v3170_v40  ;;  %1853 = vpow2.f32 %v1015_v50  ;;  %vm983_vm9 = vcmp.eq.f32.partialorder %v3179_v22, %v954_v35  ;;  %v1001_v29 = vmul.f32 1.442695, %v954_v35  ;;  %1095 = vmax.xlane.f32.xlu1 %v3365_v41 }
 0x4f6   :  { %v1033_v3 = vsel %vm985_vm5, %v1844_v2, 0.0  ;;  %v956_v51 = vpop.xlane.xlu1 %955  ;;  %v3377_v31 = vsel %vm983_vm9, -1e+30, %v3179_v22 }
 0x4f7   :  { %v1846_v8 = vpop.eup %1845  ;;  %v3380_v58 = vadd.f32 %v1033_v3, %v3182_v52  ;;  %1855 = vpow2.f32 %v1001_v29  ;;  %vm984_vm10 = vcmp.eq.f32.partialorder %v3191_v6, %v956_v51  ;;  %v1003_v40 = vmul.f32 1.442695, %v956_v51  ;;  %1081 = vmax.xlane.f32.xlu0 %v3377_v31 }
 0x4f8   :  { %v1034_v20 = vsel %vm986_vm6, %v1846_v8, 0.0  ;;  %v974_v48 = vpop.xlane.xlu0 %973  ;;  %v3389_v28 = vsel %vm984_vm10, -1e+30, %v3191_v6 }
 0x4f9   :  { %v1848_v38 = vpop.eup %1847  ;;  %v3392_v18 = vadd.f32 %v1034_v20, %v3194_v46  ;;  %1857 = vpow2.f32 %v1003_v40  ;;  %vm993_vm11 = vcmp.eq.f32.partialorder %v3203_v49, %v974_v48  ;;  %v1021_v52 = vmul.f32 1.442695, %v974_v48  ;;  %1083 = vmax.xlane.f32.xlu1 %v3389_v28 }
 0x4fa   :  { %v1039_v5 = vsel %vm991_vm7, %v1848_v38, 0.0  ;;  %v976_v14 = vpop.xlane.xlu1 %975  ;;  %v3401_v44 = vsel %vm993_vm11, -1e+30, %v3203_v49 }
 0x4fb   :  { %v1850_v60 = vpop.eup %1849  ;;  %v3404_v4 = vadd.f32 %v1039_v5, %v3206_v25  ;;  %1859 = vpow2.f32 %v1021_v52  ;;  %vm994_vm12 = vcmp.eq.f32.partialorder %v3215_v24, %v976_v14  ;;  %v1023_v46 = vmul.f32 1.442695, %v976_v14  ;;  %1101 = vmax.xlane.f32.xlu0 %v3401_v44 }
 0x4fc   :  { %v1040_v27 = vsel %vm992_vm8, %v1850_v60, 0.0  ;;  %v978_v61 = vpop.xlane.xlu0 %977  ;;  %v3413_v16 = vsel %vm994_vm12, -1e+30, %v3215_v24 }
 0x4fd   :  { %v1852_v9 = vpop.eup %1851  ;;  %v3416_v0 = vadd.f32 %v1040_v27, %v3218_v43  ;;  %1861 = vpow2.f32 %v1023_v46  ;;  %vm995_vm15 = vcmp.eq.f32.partialorder %v3227_v36, %v978_v61  ;;  %v1025_v25 = vmul.f32 1.442695, %v978_v61  ;;  %1103 = vmax.xlane.f32.xlu1 %v3413_v16 }
 0x4fe   :  { %v1037_v56 = vsel %vm989_vm13, %v1852_v9, 0.0  ;;  %v980_v47 = vpop.xlane.xlu1 %979  ;;  %v3425_v50 = vsel %vm995_vm15, -1e+30, %v3227_v36 }
 0x4ff   :  { %v1854_v63 = vpop.eup %1853  ;;  %v3428_v2 = vadd.f32 %v1037_v56, %v3230_v34  ;;  %1863 = vpow2.f32 %v1025_v25  ;;  %vm996_vm1 = vcmp.eq.f32.partialorder %v3240_v45, %v980_v47  ;;  %v1027_v43 = vmul.f32 1.442695, %v980_v47  ;;  %1105 = vmax.xlane.f32.xlu0 %v3425_v50 }
 0x500   :  { %v1038_v21 = vsel %vm990_vm14, %v1854_v63, 0.0  ;;  %v3438_v53 = vsel %vm996_vm1, -1e+30, %v3240_v45 }
 0x501   :  { %v1856_v29 = vpop.eup %1855  ;;  %v3441_v3 = vadd.f32 %v1038_v21, %v3243_v32  ;;  %1865 = vpow2.f32 %v1027_v43  ;;  %1107 = vmax.xlane.f32.xlu1 %v3438_v53 }
 0x502   :  { %v1031_v34 = vsel %vm983_vm9, %v1856_v29, 0.0 }
 0x503   :  { %v1858_v8 = vpop.eup %1857  ;;  %v3447_v40 = vadd.f32 %v1031_v34, %v3249_v26 }
 0x504   :  { %v1032_v11 = vsel %vm984_vm10, %v1858_v8, 0.0  ;;  %v1635_v8 = vld [vmem:[%s3790_s2] sm:$0xff]  }
 0x505   :  { %v1860_v7 = vpop.eup %1859  ;;  %v3452_v20 = vadd.f32 %v1032_v11, %v3254_v39  ;;  %1614 = vmatprep.subr.bf16.mxu1 %v1635_v8  ;;  %1582 = vmatprep.subr.bf16.mxu0 %v1635_v8 }
 0x506   :  { %v1041_v32 = vsel %vm993_vm11, %v1860_v7, 0.0  ;;  %1622 = vmatpush3.bf16.msra.mxu1 %v1635_v8  ;;  %1583 = vmatpush3.bf16.msra.mxu0 %v1635_v8 }
 0x507   :  { %v1862_v38 = vpop.eup %1861  ;;  %v3457_v52 = vadd.f32 %v1041_v32, %v3259_v62 }
 0x508   :  { %v1042_v22 = vsel %vm994_vm12, %v1862_v38, 0.0 }
 0x509   :  { %v1864_v35 = vpop.eup %1863  ;;  %v3462_v26 = vadd.f32 %v1042_v22, %v3264_v19 }
 0x50a   :  { %v1043_v6 = vsel %vm995_vm15, %v1864_v35, 0.0  ;;  %v1636_v35 = vld [vmem:[%s3790_s2 + $0x8] sm:$0xff]  }
 0x50b   :  { %v1866_v51 = vpop.eup %1865  ;;  %v3467_v39 = vadd.f32 %v1043_v6, %v3269_v1  ;;  %1615 = vmatprep.subr.bf16.mxu1 %v1636_v35  ;;  %1584 = vmatprep.subr.bf16.mxu0 %v1636_v35 }
 0x50c   :  { %v1044_v49 = vsel %vm996_vm1, %v1866_v51, 0.0  ;;  %1623 = vmatpush3.bf16.msra.mxu1 %v1636_v35  ;;  %1585 = vmatpush3.bf16.msra.mxu0 %v1636_v35 }
 0x50d   :  { %v3472_v62 = vadd.f32 %v1044_v49, %v3274_v17 }
 0x56d   :  { %v1078_v48 = vpop.xlane.xlu0 %1077 }
 0x56e   :  { %vm1109_vm2 = vcmp.eq.f32.partialorder %v3280_v42, %v1078_v48  ;;  %v1125_v24 = vmul.f32 1.442695, %v1078_v48 }
 0x56f   :  { %v1080_v5 = vpop.xlane.xlu1 %1079  ;;  %v3478_v36 = vsel %vm1109_vm2, -1e+30, %v3280_v42 }
 0x570   :  { %1867 = vpow2.f32 %v1125_v24  ;;  %vm1110_vm3 = vcmp.eq.f32.partialorder %v3287_v55, %v1080_v5  ;;  %v1127_v19 = vmul.f32 1.442695, %v1080_v5  ;;  %1205 = vmax.xlane.f32.xlu0 %v3478_v36 }
 0x571   :  { %v3485_v45 = vsel %vm1110_vm3, -1e+30, %v3287_v55 }
 0x572   :  { %1869 = vpow2.f32 %v1127_v19  ;;  %1207 = vmax.xlane.f32.xlu1 %v3485_v45 }
 0x574   :  { %v1090_v1 = vpop.xlane.xlu0 %1089 }
 0x575   :  { %vm1115_vm0 = vcmp.eq.f32.partialorder %v3294_v54, %v1090_v1  ;;  %v1137_v17 = vmul.f32 1.442695, %v1090_v1 }
 0x576   :  { %v1092_v14 = vpop.xlane.xlu1 %1091  ;;  %v3492_v60 = vsel %vm1115_vm0, -1e+30, %v3294_v54 }
 0x577   :  { %1871 = vpow2.f32 %v1137_v17  ;;  %vm1116_vm4 = vcmp.eq.f32.partialorder %v3301_v37, %v1092_v14  ;;  %v1139_v46 = vmul.f32 1.442695, %v1092_v14  ;;  %1217 = vmax.xlane.f32.xlu0 %v3492_v60 }
 0x578   :  { %v3496_v27 = vpop.xlane.xlu0 %1085  ;;  %v3501_v61 = vsel %vm1116_vm4, -1e+30, %v3301_v37 }
 0x579   :  { %1873 = vpow2.f32 %v1139_v46  ;;  %vm1113_vm5 = vcmp.eq.f32.partialorder %v3308_v15, %v3496_v27  ;;  %v1133_v9 = vmul.f32 1.442695, %v3496_v27  ;;  %1219 = vmax.xlane.f32.xlu1 %v3501_v61  ;;  %v1637_v46 = vld [vmem:[%s3790_s2 + $0x10] sm:$0xff]  }
 0x57a   :  { %v1868_v25 = vpop.eup %1867  ;;  %v3507_v56 = vpop.xlane.xlu1 %1087  ;;  %v3513_v47 = vsel %vm1113_vm5, -1e+30, %v3308_v15  ;;  %1616 = vmatprep.subr.bf16.mxu1 %v1637_v46  ;;  %1586 = vmatprep.subr.bf16.mxu0 %v1637_v46 }
 0x57b   :  { %v1157_v63 = vsel %vm1109_vm2, %v1868_v25, 0.0  ;;  %1875 = vpow2.f32 %v1133_v9  ;;  %vm1114_vm6 = vcmp.eq.f32.partialorder %v3320_v33, %v3507_v56  ;;  %v1135_v43 = vmul.f32 1.442695, %v3507_v56  ;;  %1213 = vmax.xlane.f32.xlu0 %v3513_v47  ;;  %1624 = vmatpush3.bf16.msra.mxu1 %v1637_v46 }
 0x57c   :  { %v1870_v21 = vpop.eup %1869  ;;  %v3522_v29 = vadd.f32 %v1157_v63, %v3315_v57  ;;  %v3524_v34 = vpop.xlane.xlu0 %1097  ;;  %v3530_v42 = vsel %vm1114_vm6, -1e+30, %v3320_v33  ;;  %1587 = vmatpush3.bf16.msra.mxu0 %v1637_v46 }
 0x57d   :  { %v1158_v11 = vsel %vm1110_vm3, %v1870_v21, 0.0  ;;  %1877 = vpow2.f32 %v1135_v43  ;;  %vm1119_vm7 = vcmp.eq.f32.partialorder %v3332_v13, %v3524_v34  ;;  %v1145_v57 = vmul.f32 1.442695, %v3524_v34  ;;  %1215 = vmax.xlane.f32.xlu1 %v3530_v42 }
 0x57e   :  { %v3542_v7 = vadd.f32 %v1158_v11, %v3327_v12  ;;  %v3544_v32 = vpop.xlane.xlu1 %1099  ;;  %v3550_v38 = vsel %vm1119_vm7, -1e+30, %v3332_v13  ;;  %v1638_v11 = vld [vmem:[%s3790_s2 + $0x18] sm:$0xff]  }
 0x57f   :  { %1879 = vpow2.f32 %v1145_v57  ;;  %vm1120_vm8 = vcmp.eq.f32.partialorder %v3339_v59, %v3544_v32  ;;  %v1147_v55 = vmul.f32 1.442695, %v3544_v32  ;;  %1225 = vmax.xlane.f32.xlu0 %v3550_v38  ;;  %1617 = vmatprep.subr.bf16.mxu1 %v1638_v11 }
 0x580   :  { %v3556_v12 = vpop.xlane.xlu0 %1093  ;;  %v3562_v22 = vsel %vm1120_vm8, -1e+30, %v3339_v59  ;;  %1588 = vmatprep.subr.bf16.mxu0 %v1638_v11  ;;  %1625 = vmatpush3.bf16.msra.mxu1 %v1638_v11 }
 0x581   :  { %v1872_v6 = vpop.eup %1871  ;;  %1881 = vpow2.f32 %v1147_v55  ;;  %vm1117_vm13 = vcmp.eq.f32.partialorder %v3350_v10, %v3556_v12  ;;  %v1141_v51 = vmul.f32 1.442695, %v3556_v12  ;;  %1227 = vmax.xlane.f32.xlu1 %v3562_v22  ;;  %1589 = vmatpush3.bf16.msra.mxu0 %v1638_v11 }
 0x582   :  { %v1163_v49 = vsel %vm1115_vm0, %v1872_v6, 0.0  ;;  %v3573_v48 = vpop.xlane.xlu1 %1095  ;;  %v3579_v24 = vsel %vm1117_vm13, -1e+30, %v3350_v10 }
 0x583   :  { %v1874_v5 = vpop.eup %1873  ;;  %v3582_v19 = vadd.f32 %v1163_v49, %v3353_v30  ;;  %1883 = vpow2.f32 %v1141_v51  ;;  %vm1118_vm14 = vcmp.eq.f32.partialorder %v3365_v41, %v3573_v48  ;;  %v1143_v54 = vmul.f32 1.442695, %v3573_v48  ;;  %1221 = vmax.xlane.f32.xlu0 %v3579_v24 }
 0x584   :  { %v1164_v1 = vsel %vm1116_vm4, %v1874_v5, 0.0  ;;  %v3590_v17 = vpop.xlane.xlu0 %1081  ;;  %v3596_v30 = vsel %vm1118_vm14, -1e+30, %v3365_v41 }
 0x585   :  { %v1876_v9 = vpop.eup %1875  ;;  %v3602_v25 = vadd.f32 %v1164_v1, %v3368_v23  ;;  %1885 = vpow2.f32 %v1143_v54  ;;  %vm1111_vm9 = vcmp.eq.f32.partialorder %v3377_v31, %v3590_v17  ;;  %v1129_v37 = vmul.f32 1.442695, %v3590_v17  ;;  %1223 = vmax.xlane.f32.xlu1 %v3596_v30 }
 0x586   :  { %v1161_v14 = vsel %vm1113_vm5, %v1876_v9, 0.0  ;;  %v3611_v63 = vpop.xlane.xlu1 %1083  ;;  %v3617_v23 = vsel %vm1111_vm9, -1e+30, %v3377_v31 }
 0x587   :  { %v1878_v43 = vpop.eup %1877  ;;  %v3620_v21 = vadd.f32 %v1161_v14, %v3380_v58  ;;  %1887 = vpow2.f32 %v1129_v37  ;;  %vm1112_vm10 = vcmp.eq.f32.partialorder %v3389_v28, %v3611_v63  ;;  %v1131_v15 = vmul.f32 1.442695, %v3611_v63  ;;  %1209 = vmax.xlane.f32.xlu0 %v3617_v23  ;;  %v1642_v63 = vld [vmem:[%s3790_s2 + $0x38] sm:$0xff]  }
 0x588   :  { %v1162_v27 = vsel %vm1114_vm6, %v1878_v43, 0.0  ;;  %v3629_v8 = vpop.xlane.xlu0 %1101  ;;  %v3635_v58 = vsel %vm1112_vm10, -1e+30, %v3389_v28 }
 0x589   :  { %v1880_v57 = vpop.eup %1879  ;;  %v3641_v55 = vadd.f32 %v1162_v27, %v3392_v18  ;;  %1889 = vpow2.f32 %v1131_v15  ;;  %vm1121_vm11 = vcmp.eq.f32.partialorder %v3401_v44, %v3629_v8  ;;  %v1149_v33 = vmul.f32 1.442695, %v3629_v8  ;;  %1211 = vmax.xlane.f32.xlu1 %v3635_v58 }
 0x58a   :  { %v1167_v56 = vsel %vm1119_vm7, %v1880_v57, 0.0  ;;  %v1104_v35 = vpop.xlane.xlu1 %1103  ;;  %v3654_v6 = vsel %vm1121_vm11, -1e+30, %v3401_v44 }
 0x58b   :  { %v1882_v18 = vpop.eup %1881  ;;  %v3657_v51 = vadd.f32 %v1167_v56, %v3404_v4  ;;  %1891 = vpow2.f32 %v1149_v33  ;;  %vm1122_vm12 = vcmp.eq.f32.partialorder %v3413_v16, %v1104_v35  ;;  %v1151_v49 = vmul.f32 1.442695, %v1104_v35  ;;  %1229 = vmax.xlane.f32.xlu0 %v3654_v6  ;;  %v1639_v4 = vld [vmem:[%s3790_s2 + $0x20] sm:$0xff]  }
 0x58c   :  { %v1168_v13 = vsel %vm1120_vm8, %v1882_v18, 0.0  ;;  %v1106_v34 = vpop.xlane.xlu0 %1105  ;;  %v3667_v5 = vsel %vm1122_vm12, -1e+30, %v3413_v16  ;;  %1618 = vmatprep.subr.bf16.mxu1 %v1639_v4  ;;  %1590 = vmatprep.subr.bf16.mxu0 %v1639_v4 }
 0x58d   :  { %v1884_v54 = vpop.eup %1883  ;;  %v3673_v1 = vadd.f32 %v1168_v13, %v3416_v0  ;;  %1893 = vpow2.f32 %v1151_v49  ;;  %vm1123_vm15 = vcmp.eq.f32.partialorder %v3425_v50, %v1106_v34  ;;  %v1153_v59 = vmul.f32 1.442695, %v1106_v34  ;;  %1231 = vmax.xlane.f32.xlu1 %v3667_v5  ;;  %1626 = vmatpush3.bf16.msra.mxu1 %v1639_v4 }
 0x58e   :  { %v1165_v32 = vsel %vm1117_vm13, %v1884_v54, 0.0  ;;  %v1108_v46 = vpop.xlane.xlu1 %1107  ;;  %v3683_v9 = vsel %vm1123_vm15, -1e+30, %v3425_v50  ;;  %1591 = vmatpush3.bf16.msra.mxu0 %v1639_v4 }
 0x58f   :  { %v1886_v0 = vpop.eup %1885  ;;  %v3686_v37 = vadd.f32 %v1165_v32, %v3428_v2  ;;  %1895 = vpow2.f32 %v1153_v59  ;;  %vm1124_vm1 = vcmp.eq.f32.partialorder %v3438_v53, %v1108_v46  ;;  %v1155_v14 = vmul.f32 1.442695, %v1108_v46  ;;  %1233 = vmax.xlane.f32.xlu0 %v3683_v9  ;;  %v1640_v2 = vld [vmem:[%s3790_s2 + $0x28] sm:$0xff]  }
 0x590   :  { %v1166_v10 = vsel %vm1118_vm14, %v1886_v0, 0.0  ;;  %v3696_v12 = vsel %vm1124_vm1, -1e+30, %v3438_v53  ;;  %1619 = vmatprep.subr.bf16.mxu1 %v1640_v2  ;;  %1592 = vmatprep.subr.bf16.mxu0 %v1640_v2 }
 0x591   :  { %v1888_v43 = vpop.eup %1887  ;;  %v3702_v15 = vadd.f32 %v1166_v10, %v3441_v3  ;;  %1897 = vpow2.f32 %v1155_v14  ;;  %1235 = vmax.xlane.f32.xlu1 %v3696_v12  ;;  %1627 = vmatpush3.bf16.msra.mxu1 %v1640_v2  ;;  %v1641_v3 = vld [vmem:[%s3790_s2 + $0x30] sm:$0xff]   ;;  %s1955_s2 = smov [#allocation2]  }
 0x592   :  { %v1159_v41 = vsel %vm1111_vm9, %v1888_v43, 0.0  ;;  %1593 = vmatpush3.bf16.msra.mxu0 %v1640_v2  ;;  %1620 = vmatprep.subr.bf16.mxu1 %v1641_v3  ;;  %s1507_s8 = sshll.u32 %s1955_s2, 4  ;;  %s1508_s8 = int_to_ptr.vmem [resolvable:$true] %s1507_s8 }
 0x593   :  { %v1890_v48 = vpop.eup %1889  ;;  %v3709_v27 = vadd.f32 %v1159_v41, %v3447_v40  ;;  %1594 = vmatprep.subr.bf16.mxu0 %v1641_v3  ;;  %s1931_s9 = scalar_lea.vmem %s1508_s8, 2048  ;;  %p1936_p1 = scmp.lt.s32.totalorder %s1508_s8, %s1508_s8 }
 0x594   :  { %v1160_v11 = vsel %vm1112_vm10, %v1890_v48, 0.0  ;;  %p1932_p0 = scmp.ne.s32.totalorder %s1508_s8, %s1931_s9  ;;  %p1937_p2 = scmp.lt.s32.totalorder %s1931_s9, %s1931_s9 }
 0x595   :  { %v1892_v57 = vpop.eup %1891  ;;  %v3718_v31 = vadd.f32 %v1160_v11, %v3452_v20  ;;  %1628 = vmatpush3.bf16.msra.mxu1 %v1641_v3 }
 0x596   :  { %v1169_v17 = vsel %vm1121_vm11, %v1892_v57, 0.0  ;;  %1595 = vmatpush3.bf16.msra.mxu0 %v1641_v3  ;;  %1621 = vmatprep.subr.bf16.mxu1 %v1642_v63  ;;  %p1938_p3 = por %p1937_p2, %p1936_p1 }
 0x597   :  { %v1894_v40 = vpop.eup %1893  ;;  %v3724_v33 = vadd.f32 %v1169_v17, %v3457_v52  ;;  %1596 = vmatprep.subr.bf16.mxu0 %v1642_v63 }
 0x598   :  { %v1170_v28 = vsel %vm1122_vm12, %v1894_v40, 0.0  ;;  %p1939_p4 = pnand %p1938_p3, %p1932_p0 }
 0x599   :  { %v1896_v20 = vpop.eup %1895  ;;  %v3732_v56 = vadd.f32 %v1170_v28, %v3462_v26  ;;  %1629 = vmatpush3.bf16.msra.mxu1 %v1642_v63 }
 0x59a   :  { %v1171_v44 = vsel %vm1123_vm15, %v1896_v20, 0.0  ;;  %1597 = vmatpush3.bf16.msra.mxu0 %v1642_v63 }
 0x59b   :  { %v1898_v52 = vpop.eup %1897  ;;  %v3737_v8 = vadd.f32 %v1171_v44, %v3467_v39 }
 0x59c   :  { %v1172_v16 = vsel %vm1124_vm1, %v1898_v52, 0.0 }
 0x59d   :  { %v3742_v35 = vadd.f32 %v1172_v16, %v3472_v62 }
 0x5fd   :  { %v1206_v18 = vpop.xlane.xlu0 %1205 }
 0x5fe   :  { %v1253_v26 = vmul.f32 1.442695, %v1206_v18  ;;  %vm1237_vm2 = vcmp.eq.f32.partialorder %v3478_v36, %v1206_v18 }
 0x5ff   :  { %v1208_v49 = vpop.xlane.xlu1 %1207 }
 0x600   :  { %1899 = vpow2.f32 %v1253_v26  ;;  %v1255_v50 = vmul.f32 1.442695, %v1208_v49  ;;  %vm1238_vm3 = vcmp.eq.f32.partialorder %v3485_v45, %v1208_v49 }
 0x602   :  { %1901 = vpow2.f32 %v1255_v50 }
 0x604   :  { %v1218_v13 = vpop.xlane.xlu0 %1217 }
 0x605   :  { %v1265_v34 = vmul.f32 1.442695, %v1218_v13  ;;  %vm1243_vm0 = vcmp.eq.f32.partialorder %v3492_v60, %v1218_v13 }
 0x606   :  { %v1220_v4 = vpop.xlane.xlu1 %1219 }
 0x607   :  { %1903 = vpow2.f32 %v1265_v34  ;;  %v1267_v39 = vmul.f32 1.442695, %v1220_v4  ;;  %vm1244_vm4 = vcmp.eq.f32.partialorder %v3501_v61, %v1220_v4 }
 0x608   :  { %v1214_v54 = vpop.xlane.xlu0 %1213 }
 0x609   :  { %1905 = vpow2.f32 %v1267_v39  ;;  %v1261_v59 = vmul.f32 1.442695, %v1214_v54  ;;  %vm1241_vm5 = vcmp.eq.f32.partialorder %v3513_v47, %v1214_v54 }
 0x60a   :  { %v1900_v53 = vpop.eup %1899  ;;  %v1216_v32 = vpop.xlane.xlu1 %1215 }
 0x60b   :  { %v1285_v62 = vsel %vm1237_vm2, %v1900_v53, 0.0  ;;  %1907 = vpow2.f32 %v1261_v59  ;;  %v1263_v46 = vmul.f32 1.442695, %v1216_v32  ;;  %vm1242_vm6 = vcmp.eq.f32.partialorder %v3530_v42, %v1216_v32 }
 0x60c   :  { %v1902_v0 = vpop.eup %1901  ;;  %v1226_v14 = vpop.xlane.xlu0 %1225  ;;  %v1301_v43 = vadd.f32 %v1285_v62, %v3522_v29 }
 0x60d   :  { %v1286_v10 = vsel %vm1238_vm3, %v1902_v0, 0.0  ;;  %1909 = vpow2.f32 %v1263_v46  ;;  %v1273_v2 = vmul.f32 1.442695, %v1226_v14  ;;  %vm1247_vm7 = vcmp.eq.f32.partialorder %v3550_v38, %v1226_v14 }
 0x60e   :  { %v1302_v41 = vadd.f32 %v1286_v10, %v3542_v7  ;;  %v1228_v48 = vpop.xlane.xlu1 %1227 }
 0x60f   :  { %1911 = vpow2.f32 %v1273_v2  ;;  %v1275_v11 = vmul.f32 1.442695, %v1228_v48  ;;  %vm1248_vm8 = vcmp.eq.f32.partialorder %v3562_v22, %v1228_v48 }
 0x610   :  { %v1222_v3 = vpop.xlane.xlu0 %1221  ;;  %v1317_v36 = vpack.c.bf16 %v1302_v41, %v1301_v43 }
 0x611   :  { %v1904_v57 = vpop.eup %1903  ;;  %1913 = vpow2.f32 %v1275_v11  ;;  %v1269_v17 = vmul.f32 1.442695, %v1222_v3  ;;  %vm1245_vm13 = vcmp.eq.f32.partialorder %v3579_v24, %v1222_v3 }
 0x612   :  { %v1224_v40 = vpop.xlane.xlu1 %1223  ;;  %1598 = vmatprep.mubr.bf16.mxu0 %v1317_v36  ;;  %v1291_v28 = vsel %vm1243_vm0, %v1904_v57, 0.0 }
 0x613   :  { %v1906_v45 = vpop.eup %1905  ;;  %1915 = vpow2.f32 %v1269_v17  ;;  %v1271_v29 = vmul.f32 1.442695, %v1224_v40  ;;  %v1307_v16 = vadd.f32 %v1291_v28, %v3582_v19  ;;  %vm1246_vm14 = vcmp.eq.f32.partialorder %v3596_v30, %v1224_v40 }
 0x614   :  { %v1292_v63 = vsel %vm1244_vm4, %v1906_v45, 0.0  ;;  %v1210_v7 = vpop.xlane.xlu0 %1209 }
 0x615   :  { %v1908_v20 = vpop.eup %1907  ;;  %v1308_v44 = vadd.f32 %v1292_v63, %v3602_v25  ;;  %1917 = vpow2.f32 %v1271_v29  ;;  %v1257_v52 = vmul.f32 1.442695, %v1210_v7  ;;  %vm1239_vm9 = vcmp.eq.f32.partialorder %v3617_v23, %v1210_v7 }
 0x616   :  { %v1212_v60 = vpop.xlane.xlu1 %1211  ;;  %v1289_v26 = vsel %vm1241_vm5, %v1908_v20, 0.0 }
 0x617   :  { %v1910_v18 = vpop.eup %1909  ;;  %1919 = vpow2.f32 %v1257_v52  ;;  %v1259_v61 = vmul.f32 1.442695, %v1212_v60  ;;  %v1320_v13 = vpack.c.bf16 %v1308_v44, %v1307_v16  ;;  %v1305_v47 = vadd.f32 %v1289_v26, %v3620_v21 }
 0x618   :  { %v1290_v49 = vsel %vm1242_vm6, %v1910_v18, 0.0  ;;  %v1230_v50 = vpop.xlane.xlu0 %1229  ;;  %vm1240_vm10 = vcmp.eq.f32.partialorder %v3635_v58, %v1212_v60 }
 0x619   :  { %v1912_v34 = vpop.eup %1911  ;;  %1921 = vpow2.f32 %v1259_v61  ;;  %v1277_v4 = vmul.f32 1.442695, %v1230_v50  ;;  %v1306_v25 = vadd.f32 %v1290_v49, %v3641_v55  ;;  %vm1249_vm11 = vcmp.eq.f32.partialorder %v3654_v6, %v1230_v50 }
 0x61a   :  { %v1232_v19 = vpop.xlane.xlu1 %1231  ;;  %v1295_v54 = vsel %vm1247_vm7, %v1912_v34, 0.0 }
 0x61b   :  { %v1914_v39 = vpop.eup %1913  ;;  %1923 = vpow2.f32 %v1277_v4  ;;  %v1279_v42 = vmul.f32 1.442695, %v1232_v19  ;;  %v1319_v32 = vpack.c.bf16 %v1306_v25, %v1305_v47  ;;  %v1311_v38 = vadd.f32 %v1295_v54, %v3657_v51 }
 0x61c   :  { %v1296_v59 = vsel %vm1248_vm8, %v1914_v39, 0.0  ;;  %v1234_v53 = vpop.xlane.xlu0 %1233  ;;  %vm1250_vm12 = vcmp.eq.f32.partialorder %v3667_v5, %v1232_v19 }
 0x61d   :  { %v1916_v62 = vpop.eup %1915  ;;  %v1312_v46 = vadd.f32 %v1296_v59, %v3673_v1  ;;  %1925 = vpow2.f32 %v1279_v42  ;;  %v1281_v55 = vmul.f32 1.442695, %v1234_v53  ;;  %1602 = vmatprep.mubr.bf16.mxu1 %v1319_v32  ;;  %vm1251_vm15 = vcmp.eq.f32.partialorder %v3683_v9, %v1234_v53 }
 0x61e   :  { %v1293_v0 = vsel %vm1245_vm13, %v1916_v62, 0.0  ;;  %v1236_v21 = vpop.xlane.xlu1 %1235  ;;  %1603 = vmatmul.mubr.bf16.vlgmr.msra.gmra.mrb[0].mxu1 %v1320_v13 }
 0x61f   :  { %v1918_v14 = vpop.eup %1917  ;;  %1927 = vpow2.f32 %v1281_v55  ;;  %v1283_v22 = vmul.f32 1.442695, %v1236_v21  ;;  %v1322_v2 = vpack.c.bf16 %v1312_v46, %v1311_v38  ;;  %v1309_v1 = vadd.f32 %v1293_v0, %v3686_v37 }
 0x620   :  { %v1294_v10 = vsel %vm1246_vm14, %v1918_v14, 0.0  ;;  %vm1252_vm1 = vcmp.eq.f32.partialorder %v3696_v12, %v1236_v21 }
 0x621   :  { %v1920_v43 = vpop.eup %1919  ;;  %v1310_v24 = vadd.f32 %v1294_v10, %v3702_v15  ;;  %1929 = vpow2.f32 %v1283_v22 }
 0x622   :  { %v1287_v51 = vsel %vm1239_vm9, %v1920_v43, 0.0 }
 0x623   :  { %v1922_v41 = vpop.eup %1921  ;;  %v1321_v48 = vpack.c.bf16 %v1310_v24, %v1309_v1  ;;  %v1303_v3 = vadd.f32 %v1287_v51, %v3709_v27 }
 0x624   :  { %v1288_v11 = vsel %vm1240_vm10, %v1922_v41, 0.0 }
 0x625   :  { %v1924_v30 = vpop.eup %1923  ;;  %v1304_v36 = vadd.f32 %v1288_v11, %v3718_v31  ;;  %1606 = vmatprep.mubr.bf16.mxu1 %v1321_v48 }
 0x626   :  { %v1297_v37 = vsel %vm1249_vm11, %v1924_v30, 0.0  ;;  %1607 = vmatmul.mubr.bf16.gmra.mrb[4].mxu1 %v1322_v2 }
 0x627   :  { %v1926_v57 = vpop.eup %1925  ;;  %v1318_v15 = vpack.c.bf16 %v1304_v36, %v1303_v3  ;;  %v1313_v58 = vadd.f32 %v1297_v37, %v3724_v33 }
 0x628   :  { %v1298_v23 = vsel %vm1250_vm12, %v1926_v57, 0.0 }
 0x629   :  { %v1928_v17 = vpop.eup %1927  ;;  %v1314_v40 = vadd.f32 %v1298_v23, %v3732_v56  ;;  %1599 = vmatmul.mubr.bf16.vlgmr.msra.gmra.mrb[16].mxu0 %v1318_v15 }
 0x62a   :  { %v1299_v27 = vsel %vm1251_vm15, %v1928_v17, 0.0 }
 0x62b   :  { %v1930_v31 = vpop.eup %1929  ;;  %v1323_v6 = vpack.c.bf16 %v1314_v40, %v1313_v58  ;;  %v1315_v28 = vadd.f32 %v1299_v27, %v3737_v8 }
 0x62c   :  { %v1300_v45 = vsel %vm1252_vm1, %v1930_v31, 0.0 }
 0x62d   :  { %v1316_v5 = vadd.f32 %v1300_v45, %v3742_v35  ;;  %1610 = vmatprep.mubr.bf16.mxu1 %v1323_v6 }
 0x62f   :  { %v1324_v29 = vpack.c.bf16 %v1316_v5, %v1315_v28 }
 0x631   :  { %1611 = vmatmul.mubr.bf16.gmra.mrb[8].mxu1 %v1324_v29 }
 0x6f1   :  { %v1604_v63 = vpop.f32.mrb[0].mxu1 }
 0x6f2   :  { %1492 = vst [vmem:[#allocation2 + $0x30] sm:$0xff] %v1604_v63  ;;  %v1439_v33 = vpop.f32.mrb[1].mxu1 }
 0x6f3   :  { %1490 = vst [vmem:[#allocation2 + $0x20] sm:$0xff] %v1439_v33  ;;  %v1605_v56 = vpop.f32.mrb[2].mxu1 }
 0x6f4   :  { %1493 = vst [vmem:[#allocation2 + $0x38] sm:$0xff] %v1605_v56  ;;  %v1442_v9 = vpop.f32.mrb[3].mxu1 }
 0x6f5   :  { %1491 = vst [vmem:[#allocation2 + $0x28] sm:$0xff] %v1442_v9 }
 0x6f9   :  { %v1608_v7 = vpop.f32.mrb[4].mxu1 }
 0x6fa   :  { %1496 = vst [vmem:[#allocation2 + $0x50] sm:$0xff] %v1608_v7  ;;  %v1455_v12 = vpop.f32.mrb[5].mxu1 }
 0x6fb   :  { %1494 = vst [vmem:[#allocation2 + $0x40] sm:$0xff] %v1455_v12  ;;  %v1609_v20 = vpop.f32.mrb[6].mxu1 }
 0x6fc   :  { %v1600_v44 = vpop.f32.mrb[16].mxu0  ;;  %1497 = vst [vmem:[#allocation2 + $0x58] sm:$0xff] %v1609_v20  ;;  %v1458_v8 = vpop.f32.mrb[7].mxu1 }
 0x6fd   :  { %1488 = vst [vmem:[#allocation2 + $0x10] sm:$0xff] %v1600_v44  ;;  %v1423_v35 = vpop.f32.mrb[17].mxu0  ;;  %1495 = vst [vmem:[#allocation2 + $0x48] sm:$0xff] %v1458_v8 }
 0x6fe   :  { %1486 = vst [vmem:[#allocation2] sm:$0xff] %v1423_v35  ;;  %v1601_v52 = vpop.f32.mrb[18].mxu0 }
 0x6ff   :  { %1489 = vst [vmem:[#allocation2 + $0x18] sm:$0xff] %v1601_v52  ;;  %v1426_v16 = vpop.f32.mrb[19].mxu0 }
 0x700   :  { %1487 = vst [vmem:[#allocation2 + $0x8] sm:$0xff] %v1426_v16 }
 0x704   :  { %v1612_v60 = vpop.f32.mrb[8].mxu1 }
 0x705   :  { %1500 = vst [vmem:[#allocation2 + $0x70] sm:$0xff] %v1612_v60  ;;  %v1471_v18 = vpop.f32.mrb[9].mxu1 }
 0x706   :  { %1498 = vst [vmem:[#allocation2 + $0x60] sm:$0xff] %v1471_v18  ;;  %v1613_v26 = vpop.f32.mrb[10].mxu1 }
 0x707   :  { %1501 = vst [vmem:[#allocation2 + $0x78] sm:$0xff] %v1613_v26  ;;  %v1474_v61 = vpop.f32.mrb[11].mxu1 }
 0x708   :  { %1499 = vst [vmem:[#allocation2 + $0x68] sm:$0xff] %v1474_v61 }
 0x709   :  { %1942 = shalt.err (!%p1939_p4)
}
 0x70a   :  { %s1943_s12 = scalar_lea.hbm %s3791_s3, 2048 }
 0x70b   :  { %p1944_p5 = scmp.ne.s32.totalorder %s3791_s3, %s1943_s12  ;;  %p1947_p6 = scmp.lt.u32.totalorder %s1943_s12, %s3791_s3 }
 0x70d   :  { %p1949_p7 = pnand %p1947_p6, %p1944_p5 }
 0x70f   :  { %1952 = shalt.err (!%p1949_p7)
}
 0x710   :  { %s1956_s0 = smov 128   ;;  %s1957_s17 = smov 8  }
 0x711   :  { %1513 = dma.vmem_to_hbm [thread:$0]  %s1508_s8, 2048, %s3791_s3, [#allocation3], %s1956_s0, %s1956_s0, %s1957_s17  }
 0x712   :  { %1953 = dma.done.wait [#allocation3], 2048  }
 0x713   :  { %1954 = vsyncadd [#allocation3], 4294965248 }
 0x714   :  { %1517 = vsyncpa [#allocation3], 1 }

</bundles_post_ra>
